<compile_context>
chip_gen: v7x
topology: tpu7x:2x2x1
jax: 0.10.0
libtpu: 0.0.40
codegen_flags: <defaults>
</compile_context>

<pallas_src>
import functools

import jax
import jax.numpy as jnp
from jax.experimental import pallas as pl
from jax.experimental.pallas import tpu as pltpu

NEG_SLOPE = 0.01  # nn.LeakyReLU() default negative_slope


def _fused_mlp_kernel(*refs, n_layers):
    """refs = (x_ref, w1_ref, b1_ref, ..., wn_ref, bn_ref, o_ref).

    Chains all Linear layers on the MXU (bf16 inputs, f32 accumulation),
    applying LeakyReLU after every layer except the last (dropout is identity
    in eval mode).  Intermediates stay in vregs/VMEM for the whole fused body.
    """
    x_ref = refs[0]
    o_ref = refs[-1]

    h = x_ref[...].astype(jnp.float32)
    for i in range(n_layers):
        w_ref = refs[1 + 2 * i]
        b_ref = refs[2 + 2 * i]
        # bf16 x bf16 -> f32 accumulate on the MXU (weights already stored bf16).
        h = jnp.dot(h.astype(jnp.bfloat16),
                    w_ref[...].astype(jnp.bfloat16),
                    preferred_element_type=jnp.float32)
        h = h + b_ref[...].astype(jnp.float32)          # VPU, hidden under weight DMA
        if i < n_layers - 1:
            h = jnp.where(h >= 0, h, NEG_SLOPE * h)     # LeakyReLU
            # Dropout: identity (inference / eval mode).
    o_ref[...] = h.astype(o_ref.dtype)


def _resident_spec(block_shape):
    """Weight/bias spec: constant index_map, single-buffered (pure VMEM saving).

    Falls back to the default (double-buffered) spec if this JAX version's
    BlockSpec does not accept pipeline_mode.
    """
    try:
        return pl.BlockSpec(block_shape, lambda i: (0, 0),
                            pipeline_mode=pl.Buffered(1))
    except TypeError:
        return pl.BlockSpec(block_shape, lambda i: (0, 0))


def mlp_forward_pallas(x, params, *, max_tm=512):
    """Fused forward pass. x: (M, units[0]); params: [(w_i, b_i)] with
    w_i shaped (in_features, out_features) (bf16), b_i shaped (out_features,).
    Returns (M, units[-1]) in x.dtype."""
    M, K0 = x.shape
    n_layers = len(params)
    N_out = params[-1][0].shape[1]

    # Tile only the batch dimension.  For M <= max_tm the block equals the full
    # dim (always legal); otherwise tm=512 (multiple of 8) with a ragged final
    # block -- Pallas masks out-of-bounds rows, so no pad/slice copies needed.
    tm = M if M <= max_tm else max_tm
    grid_m = pl.cdiv(M, tm)

    flat_inputs = [x]
    in_specs = [pl.BlockSpec((tm, K0), lambda i: (i, 0))]
    for (w, b) in params:
        kin, kout = w.shape
        flat_inputs.append(w)
        flat_inputs.append(b.reshape(1, kout))          # (1, N) row for lane-major bcast
        in_specs.append(_resident_spec((kin, kout)))
        in_specs.append(_resident_spec((1, kout)))

    # Advisory cost estimate so XLA doesn't over-schedule around a tiny kernel.
    flops = 0
    bytes_accessed = (x.size * x.dtype.itemsize
                      + M * N_out * x.dtype.itemsize)
    for (w, b) in params:
        flops += 2 * M * w.shape[0] * w.shape[1]
        bytes_accessed += w.size * w.dtype.itemsize + b.size * b.dtype.itemsize

    kernel = functools.partial(_fused_mlp_kernel, n_layers=n_layers)
    out = pl.pallas_call(
        kernel,
        out_shape=jax.ShapeDtypeStruct((M, N_out), x.dtype),
        grid_spec=pltpu.PrefetchScalarGridSpec(
            num_scalar_prefetch=0,
            grid=(grid_m,),
            in_specs=in_specs,
            out_specs=pl.BlockSpec((tm, N_out), lambda i: (i, 0)),
        ),
        compiler_params=pltpu.CompilerParams(
            dimension_semantics=("parallel",),
        ),
        cost_estimate=pl.CostEstimate(
            flops=flops, transcendentals=0, bytes_accessed=bytes_accessed
        ),
    )(*flat_inputs)

    return out


def init_mlp_params(key, units, weight_dtype=jnp.bfloat16):
    """Deterministic init mimicking nn.Linear's U(-1/sqrt(fan_in), 1/sqrt(fan_in)).
    Weights are stored as (in_features, out_features) == PyTorch weight.T and
    cast once to bf16 (halves the weight-DMA bytes, the kernel's roofline term)."""
    params = []
    for u0, u1 in zip(units[:-1], units[1:]):
        key, kw, kb = jax.random.split(key, 3)
        bound = 1.0 / (u0 ** 0.5)
        w = jax.random.uniform(kw, (u0, u1), jnp.float32, -bound, bound)
        b = jax.random.uniform(kb, (u1,), jnp.float32, -bound, bound)
        params.append((w.astype(weight_dtype), b))
    return params


@jax.jit
def mlp_forward(x, params):
    """Replicates MLPLayers.forward (eval mode): LeakyReLU after every layer
    except the last; dropout is identity."""
    return mlp_forward_pallas(x, params)


if __name__ == "__main__":
    units = [1024, 512, 256, 128]  # module default
    batch = 8

    key = jax.random.PRNGKey(0)
    key, kx = jax.random.split(key)
    x = jax.random.normal(kx, (batch, units[0]), dtype=jnp.float32)
    params = init_mlp_params(key, units)

    out = mlp_forward(x, params)
    jax.block_until_ready(out)

    # Sanity check against a plain-JAX reference that mirrors the kernel's
    # precision (bf16 matmul inputs, f32 accumulation / bias / activation).
    ref = x
    for idx, (w, b) in enumerate(params):
        a_bf = ref.astype(jnp.bfloat16).astype(jnp.float32)
        w_f32 = w.astype(jnp.float32)
        ref = a_bf @ w_f32 + b
        if idx < len(params) - 1:
            ref = jnp.where(ref >= 0, ref, NEG_SLOPE * ref)

    assert out.shape == (batch, units[-1])
    assert jnp.allclose(out, ref, atol=2e-2, rtol=2e-2), (
        float(jnp.max(jnp.abs(out - ref))))

    print("KERNEL_OK")
</pallas_src>

<mosaic_0001>
module attributes {stable_mosaic.version = 11 : i64} {
  func.func @_fused_mlp_kernel(%arg0: i32, %arg1: memref<8x1024xf32, #tpu.memory_space<vmem>>, %arg2: memref<1024x512xbf16, #tpu.memory_space<vmem>>, %arg3: memref<1x512xf32, #tpu.memory_space<vmem>>, %arg4: memref<512x256xbf16, #tpu.memory_space<vmem>>, %arg5: memref<1x256xf32, #tpu.memory_space<vmem>>, %arg6: memref<256x128xbf16, #tpu.memory_space<vmem>>, %arg7: memref<1x128xf32, #tpu.memory_space<vmem>>, %arg8: memref<8x128xf32, #tpu.memory_space<vmem>>) attributes {dimension_semantics = [#tpu.dimension_semantics<parallel>], iteration_bounds = array<i64: 1>, scalar_prefetch = 0 : i64, scratch_operands = 0 : i64, tpu.core_type = #tpu.core_type<tc>, window_params = [{transform_indices = @transform_0, window_bounds = array<i64: 8, 1024>}, {pipeline_mode = #tpu.pipeline_mode<synchronous>, transform_indices = @transform_1, window_bounds = array<i64: 1024, 512>}, {pipeline_mode = #tpu.pipeline_mode<synchronous>, transform_indices = @transform_2, window_bounds = array<i64: 1, 512>}, {pipeline_mode = #tpu.pipeline_mode<synchronous>, transform_indices = @transform_3, window_bounds = array<i64: 512, 256>}, {pipeline_mode = #tpu.pipeline_mode<synchronous>, transform_indices = @transform_4, window_bounds = array<i64: 1, 256>}, {pipeline_mode = #tpu.pipeline_mode<synchronous>, transform_indices = @transform_5, window_bounds = array<i64: 256, 128>}, {pipeline_mode = #tpu.pipeline_mode<synchronous>, transform_indices = @transform_6, window_bounds = array<i64: 1, 128>}, {transform_indices = @transform_7, window_bounds = array<i64: 8, 128>}]} {
    %c0 = arith.constant 0 : index
    %c0_0 = arith.constant 0 : index
    %0 = vector.load %arg1[%c0, %c0_0] : memref<8x1024xf32, #tpu.memory_space<vmem>>, vector<8x1024xf32>
    %1 = arith.truncf %0 : vector<8x1024xf32> to vector<8x1024xbf16>
    %c0_1 = arith.constant 0 : index
    %c0_2 = arith.constant 0 : index
    %2 = vector.load %arg2[%c0_1, %c0_2] : memref<1024x512xbf16, #tpu.memory_space<vmem>>, vector<1024x512xbf16>
    %cst = arith.constant dense<0.000000e+00> : vector<8x512xf32>
    %3 = tpu.matmul %1, %2, %cst {dimension_numbers = #tpu.dot_dimension_numbers<[1], [0], [0], [1], [0, 0, 1, 1], [], []>} : vector<8x1024xbf16>, vector<1024x512xbf16>, vector<8x512xf32> -> vector<8x512xf32>
    %c0_3 = arith.constant 0 : index
    %c0_4 = arith.constant 0 : index
    %4 = vector.load %arg3[%c0_3, %c0_4] : memref<1x512xf32, #tpu.memory_space<vmem>>, vector<1x512xf32>
    %5 = vector.broadcast %4 : vector<1x512xf32> to vector<8x512xf32>
    %6 = arith.addf %3, %5 : vector<8x512xf32>
    %cst_5 = arith.constant 0.000000e+00 : f32
    %7 = vector.broadcast %cst_5 : f32 to vector<8x512xf32>
    %8 = arith.cmpf oge, %6, %7 : vector<8x512xf32>
    %cst_6 = arith.constant 0.00999999977 : f32
    %9 = vector.broadcast %cst_6 : f32 to vector<8x512xf32>
    %10 = arith.mulf %9, %6 : vector<8x512xf32>
    %11 = arith.select %8, %6, %10 : vector<8x512xi1>, vector<8x512xf32>
    %12 = arith.truncf %11 : vector<8x512xf32> to vector<8x512xbf16>
    %c0_7 = arith.constant 0 : index
    %c0_8 = arith.constant 0 : index
    %13 = vector.load %arg4[%c0_7, %c0_8] : memref<512x256xbf16, #tpu.memory_space<vmem>>, vector<512x256xbf16>
    %cst_9 = arith.constant dense<0.000000e+00> : vector<8x256xf32>
    %14 = tpu.matmul %12, %13, %cst_9 {dimension_numbers = #tpu.dot_dimension_numbers<[1], [0], [0], [1], [0, 0, 1, 1], [], []>} : vector<8x512xbf16>, vector<512x256xbf16>, vector<8x256xf32> -> vector<8x256xf32>
    %c0_10 = arith.constant 0 : index
    %c0_11 = arith.constant 0 : index
    %15 = vector.load %arg5[%c0_10, %c0_11] : memref<1x256xf32, #tpu.memory_space<vmem>>, vector<1x256xf32>
    %16 = vector.broadcast %15 : vector<1x256xf32> to vector<8x256xf32>
    %17 = arith.addf %14, %16 : vector<8x256xf32>
    %cst_12 = arith.constant 0.000000e+00 : f32
    %18 = vector.broadcast %cst_12 : f32 to vector<8x256xf32>
    %19 = arith.cmpf oge, %17, %18 : vector<8x256xf32>
    %cst_13 = arith.constant 0.00999999977 : f32
    %20 = vector.broadcast %cst_13 : f32 to vector<8x256xf32>
    %21 = arith.mulf %20, %17 : vector<8x256xf32>
    %22 = arith.select %19, %17, %21 : vector<8x256xi1>, vector<8x256xf32>
    %23 = arith.truncf %22 : vector<8x256xf32> to vector<8x256xbf16>
    %c0_14 = arith.constant 0 : index
    %c0_15 = arith.constant 0 : index
    %24 = vector.load %arg6[%c0_14, %c0_15] : memref<256x128xbf16, #tpu.memory_space<vmem>>, vector<256x128xbf16>
    %cst_16 = arith.constant dense<0.000000e+00> : vector<8x128xf32>
    %25 = tpu.matmul %23, %24, %cst_16 {dimension_numbers = #tpu.dot_dimension_numbers<[1], [0], [0], [1], [0, 0, 1, 1], [], []>} : vector<8x256xbf16>, vector<256x128xbf16>, vector<8x128xf32> -> vector<8x128xf32>
    %c0_17 = arith.constant 0 : index
    %c0_18 = arith.constant 0 : index
    %26 = vector.load %arg7[%c0_17, %c0_18] : memref<1x128xf32, #tpu.memory_space<vmem>>, vector<1x128xf32>
    %27 = vector.broadcast %26 : vector<1x128xf32> to vector<8x128xf32>
    %28 = arith.addf %25, %27 : vector<8x128xf32>
    %c0_19 = arith.constant 0 : index
    %c0_20 = arith.constant 0 : index
    %29 = vector.load %arg8[%c0_19, %c0_20] : memref<8x128xf32, #tpu.memory_space<vmem>>, vector<8x128xf32>
    tpu.vector_store %arg8[%c0_19, %c0_20], %28 {strides = array<i32>} : memref<8x128xf32, #tpu.memory_space<vmem>>, vector<8x128xf32>,
    return
  }
  func.func @transform_0(%arg0: i32) -> (i32, i32) {
    %c0_i32 = arith.constant 0 : i32
    %c0_i32_0 = arith.constant 0 : i32
    return %arg0, %c0_i32 : i32, i32
  }
  func.func @transform_1(%arg0: i32) -> (i32, i32) {
    %c0_i32 = arith.constant 0 : i32
    %c0_i32_0 = arith.constant 0 : i32
    %c0_i32_1 = arith.constant 0 : i32
    return %c0_i32, %c0_i32_0 : i32, i32
  }
  func.func @transform_2(%arg0: i32) -> (i32, i32) {
    %c0_i32 = arith.constant 0 : i32
    %c0_i32_0 = arith.constant 0 : i32
    %c0_i32_1 = arith.constant 0 : i32
    return %c0_i32, %c0_i32_0 : i32, i32
  }
  func.func @transform_3(%arg0: i32) -> (i32, i32) {
    %c0_i32 = arith.constant 0 : i32
    %c0_i32_0 = arith.constant 0 : i32
    %c0_i32_1 = arith.constant 0 : i32
    return %c0_i32, %c0_i32_0 : i32, i32
  }
  func.func @transform_4(%arg0: i32) -> (i32, i32) {
    %c0_i32 = arith.constant 0 : i32
    %c0_i32_0 = arith.constant 0 : i32
    %c0_i32_1 = arith.constant 0 : i32
    return %c0_i32, %c0_i32_0 : i32, i32
  }
  func.func @transform_5(%arg0: i32) -> (i32, i32) {
    %c0_i32 = arith.constant 0 : i32
    %c0_i32_0 = arith.constant 0 : i32
    %c0_i32_1 = arith.constant 0 : i32
    return %c0_i32, %c0_i32_0 : i32, i32
  }
  func.func @transform_6(%arg0: i32) -> (i32, i32) {
    %c0_i32 = arith.constant 0 : i32
    %c0_i32_0 = arith.constant 0 : i32
    %c0_i32_1 = arith.constant 0 : i32
    return %c0_i32, %c0_i32_0 : i32, i32
  }
  func.func @transform_7(%arg0: i32) -> (i32, i32) {
    %c0_i32 = arith.constant 0 : i32
    %c0_i32_0 = arith.constant 0 : i32
    return %arg0, %c0_i32 : i32, i32
  }
}

</mosaic_0001>

<bundles_post_ra>
// kernel: mlp_forward.1
= control target key start
LH: loop header
LB: loop body
LE: loop exit
PB: predicated region body
PF: predicated region fallthrough
CT: control target
= control target key end

     0   :  { %12 = vsyncpa [#allocation3], 0  ;;  %s3866_s0 = inlined_call_operand.hbm [shape: f32[8,1024], index: 0, kind: input, shape index: {}]   ;;  %s3867_s1 = inlined_call_operand.hbm [shape: bf16[1024,512], index: 1, kind: input, shape index: {}]   ;;  %s3868_s2 = inlined_call_operand.vmem [shape: f32[1,512], index: 2, kind: input, shape index: {}]   ;;  %s3869_s3 = inlined_call_operand.hbm [shape: bf16[512,256], index: 3, kind: input, shape index: {}]   ;;  %s3870_s4 = inlined_call_operand.vmem [shape: f32[1,256], index: 4, kind: input, shape index: {}]   ;;  %s3871_s5 = inlined_call_operand.hbm [shape: bf16[256,128], index: 5, kind: input, shape index: {}]   ;;  %s3872_s6 = inlined_call_operand.vmem [shape: f32[1,128], index: 6, kind: input, shape index: {}]   ;;  %s3873_s7 = inlined_call_operand.hbm [shape: f32[8,128], index: 7, kind: output, shape index: {}]  }
   0x1   :  { %13 = vsyncpa [#allocation6], 0 }
   0x2   :  { %14 = vsyncpa [#allocation9], 0 }
   0x3   :  { %15 = vsyncpa [#allocation4], 0  ;;  %s3694_s24 = smov [#allocation5]   ;;  %s3576_s28 = scalar_lea.hbm %s3867_s1, 32768 }
   0x4   :  { %s31_s25 = sshll.u32 %s3694_s24, 4  ;;  %p3577_p0 = scmp.ne.s32.totalorder %s3867_s1, %s3576_s28  ;;  %s32_s25 = int_to_ptr.vmem [resolvable:$true] %s31_s25 }
   0x5   :  { %p3580_p1 = scmp.lt.u32.totalorder %s3576_s28, %s3867_s1 }
   0x7   :  { %p3582_p2 = pnand %p3580_p1, %p3577_p0 }
   0x9   :  { %3585 = shalt.err (!%p3582_p2)
}
   0xa   :  { %s3586_s10 = scalar_lea.vmem %s32_s25, 32768  ;;  %p3591_p4 = scmp.lt.s32.totalorder %s32_s25, %s32_s25 }
   0xb   :  { %p3587_p3 = scmp.ne.s32.totalorder %s32_s25, %s3586_s10  ;;  %p3592_p5 = scmp.lt.s32.totalorder %s3586_s10, %s3586_s10 }
   0xd   :  { %p3593_p6 = por %p3592_p5, %p3591_p4 }
   0xf   :  { %p3594_p7 = pnand %p3593_p6, %p3587_p3 }
  0x11   :  { %3597 = shalt.err (!%p3594_p7)
}
  0x12   :  { %s3695_s11 = smov 256   ;;  %s3696_s12 = smov 16  }
  0x13   :  { %37 = dma.hbm_to_vmem [thread:$0]  %s3867_s1, 32768, %s32_s25, [#allocation6], %s3695_s11, %s3695_s11, %s3696_s12  }
  0x14   :  { %s3697_s15 = smov [#allocation2]   ;;  %s3698_s17 = smov [#allocation7]  }
  0x15   :  { %s22_s16 = sshll.u32 %s3697_s15, 4  ;;  %s45_s18 = sshll.u32 %s3698_s17, 4  ;;  %s23_s16 = int_to_ptr.vmem [resolvable:$true] %s22_s16  ;;  %s46_s18 = int_to_ptr.vmem [resolvable:$true] %s45_s18 }
  0x16   :  { %s3598_s21 = scalar_lea.hbm %s3866_s0, 1024 }
  0x17   :  { %p3599_p8 = scmp.ne.s32.totalorder %s3866_s0, %s3598_s21  ;;  %p3602_p9 = scmp.lt.u32.totalorder %s3598_s21, %s3866_s0 }
  0x19   :  { %p3604_p10 = pnand %p3602_p9, %p3599_p8 }
  0x1b   :  { %3607 = shalt.err (!%p3604_p10)
}
  0x1c   :  { %s3608_s1 = scalar_lea.vmem %s23_s16, 1024  ;;  %p3613_p12 = scmp.lt.s32.totalorder %s23_s16, %s23_s16 }
  0x1d   :  { %p3609_p11 = scmp.ne.s32.totalorder %s23_s16, %s3608_s1  ;;  %p3614_p13 = scmp.lt.s32.totalorder %s3608_s1, %s3608_s1 }
  0x1f   :  { %p3615_p0 = por %p3614_p13, %p3613_p12 }
  0x21   :  { %p3616_p1 = pnand %p3615_p0, %p3609_p11 }
  0x23   :  { %3619 = shalt.err (!%p3616_p1)
}
  0x24   :  { %25 = dma.hbm_to_vmem [thread:$0]  %s3866_s0, 1024, %s23_s16, [#allocation3]  }
  0x25   :  { %s3620_s30 = scalar_lea.hbm %s3869_s3, 8192 }
  0x26   :  { %p3621_p2 = scmp.ne.s32.totalorder %s3869_s3, %s3620_s30  ;;  %p3624_p3 = scmp.lt.u32.totalorder %s3620_s30, %s3869_s3 }
  0x28   :  { %p3626_p4 = pnand %p3624_p3, %p3621_p2 }
  0x2a   :  { %3629 = shalt.err (!%p3626_p4)
}
  0x2b   :  { %s3630_s12 = scalar_lea.vmem %s46_s18, 8192  ;;  %p3635_p6 = scmp.lt.s32.totalorder %s46_s18, %s46_s18 }
  0x2c   :  { %p3631_p5 = scmp.ne.s32.totalorder %s46_s18, %s3630_s12  ;;  %p3636_p7 = scmp.lt.s32.totalorder %s3630_s12, %s3630_s12 }
  0x2e   :  { %p3637_p8 = por %p3636_p7, %p3635_p6 }
  0x30   :  { %p3638_p9 = pnand %p3637_p8, %p3631_p5 }
  0x32   :  { %3641 = shalt.err (!%p3638_p9)
}
  0x33   :  { %s3699_s0 = smov 128   ;;  %s3700_s13 = smov 8  }
  0x34   :  { %51 = dma.hbm_to_vmem [thread:$0]  %s3869_s3, 8192, %s46_s18, [#allocation6], %s3699_s0, %s3699_s0, %s3700_s13  }
  0x35   :  { %s3701_s16 = smov [#allocation8]   ;;  %s3642_s21 = scalar_lea.hbm %s3871_s5, 2048 }
  0x36   :  { %s59_s17 = sshll.u32 %s3701_s16, 4  ;;  %p3643_p10 = scmp.ne.s32.totalorder %s3871_s5, %s3642_s21  ;;  %s60_s17 = int_to_ptr.vmem [resolvable:$true] %s59_s17 }
  0x37   :  { %p3646_p11 = scmp.lt.u32.totalorder %s3642_s21, %s3871_s5 }
  0x39   :  { %p3648_p12 = pnand %p3646_p11, %p3643_p10 }
  0x3b   :  { %3651 = shalt.err (!%p3648_p12)
}
  0x3c   :  { %s3652_s1 = scalar_lea.vmem %s60_s17, 2048  ;;  %p3657_p0 = scmp.lt.s32.totalorder %s60_s17, %s60_s17 }
  0x3d   :  { %p3653_p13 = scmp.ne.s32.totalorder %s60_s17, %s3652_s1  ;;  %p3658_p1 = scmp.lt.s32.totalorder %s3652_s1, %s3652_s1 }
  0x3f   :  { %p3659_p2 = por %p3658_p1, %p3657_p0 }
  0x41   :  { %p3660_p3 = pnand %p3659_p2, %p3653_p13 }
  0x43   :  { %3663 = shalt.err (!%p3660_p3)
}
  0x44   :  { %s3702_s3 = smov 64   ;;  %s3703_s18 = smov 4  }
  0x45   :  { %65 = dma.hbm_to_vmem [thread:$0]  %s3871_s5, 2048, %s60_s17, [#allocation9], %s3702_s3, %s3702_s3, %s3703_s18  }
  0x46   :  { %3686 = dma.done.wait [#allocation3], 1024  }
  0x47   :  { %3687 = vsyncadd [#allocation3], 4294966272 }
  0x48   :  { %3688 = dma.done.wait [#allocation6], 40960  }
  0x49   :  { %3689 = vsyncadd [#allocation6], 4294926336 }
  0x4a   :  { %3690 = dma.done.wait [#allocation9], 2048  }
  0x4b   :  { %3691 = vsyncadd [#allocation9], 4294965248  ;;  %v3080_v0 = vld [vmem:[#allocation5 + $0x4] ss:$16 sps:$4 sm:$0xff]   ;;  %v3084_v2 = vld [vmem:[#allocation5] ss:$16 sps:$4 sm:$0xff]  }
  0x4c   :  { %v3082_v1 = vld [vmem:[#allocation5 + $0x204] ss:$16 sps:$4 sm:$0xff]   ;;  %1655 = vmatprep.subr.bf16.mxu1 %v3080_v0  ;;  %v3085_v3 = vld [vmem:[#allocation5 + $0x200] ss:$16 sps:$4 sm:$0xff]   ;;  %v82_v46 = vld [vmem:[#allocation2 + $0x8] sm:$0xff]  ;;  %s3704_s8 = smov [#allocation10]  }
  0x4d   :  { %1696 = vmatprep.subr.bf16.mxu0 %v3082_v1  ;;  %v3086_v4 = vld [vmem:[#allocation5 + $0x24] ss:$16 sps:$4 sm:$0xff]   ;;  %1656 = vmatpush1.bf16.msra.mxu1 %v3084_v2  ;;  %v3090_v6 = vld [vmem:[#allocation5 + $0x20] ss:$16 sps:$4 sm:$0xff]   ;;  %v3793_v48 = vpack.c.bf16 %v82_v46, %v82_v46  ;;  %v84_v49 = vld [vmem:[#allocation2 + $0x18] sm:$0xff]  ;;  %s2667_s9 = sshll.u32 %s3704_s8, 4  ;;  %s2668_s9 = int_to_ptr.vmem [resolvable:$true] %s2667_s9 }
  0x4e   :  { %1697 = vmatpush1.bf16.msra.mxu0 %v3085_v3  ;;  %v3088_v5 = vld [vmem:[#allocation5 + $0x224] ss:$16 sps:$4 sm:$0xff]   ;;  %1657 = vmatprep.subr.bf16.mxu1 %v3086_v4  ;;  %v3091_v7 = vld [vmem:[#allocation5 + $0x220] ss:$16 sps:$4 sm:$0xff]   ;;  %v3795_v52 = vpack.c.bf16 %v84_v49, %v84_v49  ;;  %v3233_v49 = vld [vmem:[#allocation5 + $0x128] ss:$16 sps:$4 sm:$0xff]   ;;  %p3669_p5 = scmp.lt.s32.totalorder %s2668_s9, %s2668_s9 }
  0x4f   :  { %1698 = vmatprep.subr.bf16.mxu0 %v3088_v5  ;;  %v3092_v8 = vld [vmem:[#allocation5 + $0x44] ss:$16 sps:$4 sm:$0xff]   ;;  %v3096_v10 = vld [vmem:[#allocation5 + $0x40] ss:$16 sps:$4 sm:$0xff]   ;;  %1687 = vmatprep.mubr.bf16.mxu1 %v3793_v48  ;;  %s3664_s10 = scalar_lea.vmem %s2668_s9, 128 }
  0x50   :  { %v3094_v9 = vld [vmem:[#allocation5 + $0x244] ss:$16 sps:$4 sm:$0xff]   ;;  %v3097_v11 = vld [vmem:[#allocation5 + $0x240] ss:$16 sps:$4 sm:$0xff]   ;;  %1728 = vmatprep.mubr.bf16.mxu0 %v3795_v52  ;;  %p3665_p4 = scmp.ne.s32.totalorder %s2668_s9, %s3664_s10  ;;  %p3670_p6 = scmp.lt.s32.totalorder %s3664_s10, %s3664_s10 }
  0x51   :  { %1658 = vmatpush1.bf16.msra.mxu1 %v3090_v6  ;;  %v3098_v12 = vld [vmem:[#allocation5 + $0x64] ss:$16 sps:$4 sm:$0xff]   ;;  %v3102_v14 = vld [vmem:[#allocation5 + $0x60] ss:$16 sps:$4 sm:$0xff]  }
  0x52   :  { %1699 = vmatpush1.bf16.msra.mxu0 %v3091_v7  ;;  %1659 = vmatprep.subr.bf16.mxu1 %v3092_v8  ;;  %v3100_v13 = vld [vmem:[#allocation5 + $0x264] ss:$16 sps:$4 sm:$0xff]   ;;  %v3103_v15 = vld [vmem:[#allocation5 + $0x260] ss:$16 sps:$4 sm:$0xff]   ;;  %v3181_v7 = vld [vmem:[#allocation5 + $0xc] ss:$16 sps:$4 sm:$0xff]   ;;  %p3671_p7 = por %p3670_p6, %p3669_p5 }
  0x53   :  { %1700 = vmatprep.subr.bf16.mxu0 %v3094_v9  ;;  %v3104_v16 = vld [vmem:[#allocation5 + $0x84] ss:$16 sps:$4 sm:$0xff]   ;;  %v3108_v18 = vld [vmem:[#allocation5 + $0x80] ss:$16 sps:$4 sm:$0xff]  }
  0x54   :  { %v3106_v17 = vld [vmem:[#allocation5 + $0x284] ss:$16 sps:$4 sm:$0xff]   ;;  %v3109_v19 = vld [vmem:[#allocation5 + $0x280] ss:$16 sps:$4 sm:$0xff]   ;;  %p3672_p8 = pnand %p3671_p7, %p3665_p4 }
  0x55   :  { %1660 = vmatpush1.bf16.msra.mxu1 %v3096_v10  ;;  %v3110_v20 = vld [vmem:[#allocation5 + $0xa4] ss:$16 sps:$4 sm:$0xff]   ;;  %v3114_v22 = vld [vmem:[#allocation5 + $0xa0] ss:$16 sps:$4 sm:$0xff]   ;;  %v3179_v10 = vld [vmem:[#allocation5 + $0x8] ss:$16 sps:$4 sm:$0xff]  }
  0x56   :  { %1701 = vmatpush1.bf16.msra.mxu0 %v3097_v11  ;;  %1661 = vmatprep.subr.bf16.mxu1 %v3098_v12  ;;  %v3112_v21 = vld [vmem:[#allocation5 + $0x2a4] ss:$16 sps:$4 sm:$0xff]   ;;  %v3115_v23 = vld [vmem:[#allocation5 + $0x2a0] ss:$16 sps:$4 sm:$0xff]  }
  0x57   :  { %1702 = vmatprep.subr.bf16.mxu0 %v3100_v13  ;;  %v3116_v24 = vld [vmem:[#allocation5 + $0xc4] ss:$16 sps:$4 sm:$0xff]   ;;  %v3120_v26 = vld [vmem:[#allocation5 + $0xc0] ss:$16 sps:$4 sm:$0xff]   ;;  %v3187_v13 = vld [vmem:[#allocation5 + $0x2c] ss:$16 sps:$4 sm:$0xff]  }
  0x58   :  { %v3118_v25 = vld [vmem:[#allocation5 + $0x2c4] ss:$16 sps:$4 sm:$0xff]   ;;  %v3121_v27 = vld [vmem:[#allocation5 + $0x2c0] ss:$16 sps:$4 sm:$0xff]  }
  0x59   :  { %1662 = vmatpush1.bf16.msra.mxu1 %v3102_v14  ;;  %v3122_v28 = vld [vmem:[#allocation5 + $0xe4] ss:$16 sps:$4 sm:$0xff]   ;;  %v3126_v30 = vld [vmem:[#allocation5 + $0xe0] ss:$16 sps:$4 sm:$0xff]  }
  0x5a   :  { %1703 = vmatpush1.bf16.msra.mxu0 %v3103_v15  ;;  %1663 = vmatprep.subr.bf16.mxu1 %v3104_v16  ;;  %v3124_v29 = vld [vmem:[#allocation5 + $0x2e4] ss:$16 sps:$4 sm:$0xff]   ;;  %v3127_v31 = vld [vmem:[#allocation5 + $0x2e0] ss:$16 sps:$4 sm:$0xff]   ;;  %v3185_v15 = vld [vmem:[#allocation5 + $0x28] ss:$16 sps:$4 sm:$0xff]  }
  0x5b   :  { %1704 = vmatprep.subr.bf16.mxu0 %v3106_v17  ;;  %v3128_v32 = vld [vmem:[#allocation5 + $0x104] ss:$16 sps:$4 sm:$0xff]   ;;  %v3132_v34 = vld [vmem:[#allocation5 + $0x100] ss:$16 sps:$4 sm:$0xff]   ;;  %v3193_v17 = vld [vmem:[#allocation5 + $0x4c] ss:$16 sps:$4 sm:$0xff]  }
  0x5c   :  { %v3130_v33 = vld [vmem:[#allocation5 + $0x304] ss:$16 sps:$4 sm:$0xff]   ;;  %v3133_v35 = vld [vmem:[#allocation5 + $0x300] ss:$16 sps:$4 sm:$0xff]  }
  0x5d   :  { %1664 = vmatpush1.bf16.msra.mxu1 %v3108_v18  ;;  %v3134_v36 = vld [vmem:[#allocation5 + $0x124] ss:$16 sps:$4 sm:$0xff]   ;;  %v3138_v38 = vld [vmem:[#allocation5 + $0x120] ss:$16 sps:$4 sm:$0xff]  }
  0x5e   :  { %1705 = vmatpush1.bf16.msra.mxu0 %v3109_v19  ;;  %1665 = vmatprep.subr.bf16.mxu1 %v3110_v20  ;;  %v3136_v37 = vld [vmem:[#allocation5 + $0x324] ss:$16 sps:$4 sm:$0xff]   ;;  %v3139_v39 = vld [vmem:[#allocation5 + $0x320] ss:$16 sps:$4 sm:$0xff]   ;;  %v3191_v19 = vld [vmem:[#allocation5 + $0x48] ss:$16 sps:$4 sm:$0xff]  }
  0x5f   :  { %1706 = vmatprep.subr.bf16.mxu0 %v3112_v21  ;;  %v3140_v40 = vld [vmem:[#allocation5 + $0x144] ss:$16 sps:$4 sm:$0xff]   ;;  %v3144_v42 = vld [vmem:[#allocation5 + $0x140] ss:$16 sps:$4 sm:$0xff]   ;;  %v3199_v21 = vld [vmem:[#allocation5 + $0x6c] ss:$16 sps:$4 sm:$0xff]  }
  0x60   :  { %v3142_v41 = vld [vmem:[#allocation5 + $0x344] ss:$16 sps:$4 sm:$0xff]   ;;  %v3145_v43 = vld [vmem:[#allocation5 + $0x340] ss:$16 sps:$4 sm:$0xff]  }
  0x61   :  { %1666 = vmatpush1.bf16.msra.mxu1 %v3114_v22  ;;  %v3146_v44 = vld [vmem:[#allocation5 + $0x164] ss:$16 sps:$4 sm:$0xff]   ;;  %v3150_v47 = vld [vmem:[#allocation5 + $0x160] ss:$16 sps:$4 sm:$0xff]  }
  0x62   :  { %1707 = vmatpush1.bf16.msra.mxu0 %v3115_v23  ;;  %1667 = vmatprep.subr.bf16.mxu1 %v3116_v24  ;;  %v3148_v45 = vld [vmem:[#allocation5 + $0x364] ss:$16 sps:$4 sm:$0xff]   ;;  %v3151_v50 = vld [vmem:[#allocation5 + $0x360] ss:$16 sps:$4 sm:$0xff]   ;;  %v3197_v23 = vld [vmem:[#allocation5 + $0x68] ss:$16 sps:$4 sm:$0xff]  }
  0x63   :  { %1708 = vmatprep.subr.bf16.mxu0 %v3118_v25  ;;  %v3152_v51 = vld [vmem:[#allocation5 + $0x184] ss:$16 sps:$4 sm:$0xff]   ;;  %v3156_v54 = vld [vmem:[#allocation5 + $0x180] ss:$16 sps:$4 sm:$0xff]   ;;  %v3205_v25 = vld [vmem:[#allocation5 + $0x8c] ss:$16 sps:$4 sm:$0xff]  }
  0x64   :  { %v3154_v53 = vld [vmem:[#allocation5 + $0x384] ss:$16 sps:$4 sm:$0xff]   ;;  %v3157_v55 = vld [vmem:[#allocation5 + $0x380] ss:$16 sps:$4 sm:$0xff]  }
  0x65   :  { %1668 = vmatpush1.bf16.msra.mxu1 %v3120_v26  ;;  %v3158_v56 = vld [vmem:[#allocation5 + $0x1a4] ss:$16 sps:$4 sm:$0xff]   ;;  %v3162_v58 = vld [vmem:[#allocation5 + $0x1a0] ss:$16 sps:$4 sm:$0xff]  }
  0x66   :  { %1709 = vmatpush1.bf16.msra.mxu0 %v3121_v27  ;;  %1669 = vmatprep.subr.bf16.mxu1 %v3122_v28  ;;  %v3160_v57 = vld [vmem:[#allocation5 + $0x3a4] ss:$16 sps:$4 sm:$0xff]   ;;  %v3163_v59 = vld [vmem:[#allocation5 + $0x3a0] ss:$16 sps:$4 sm:$0xff]   ;;  %v3203_v27 = vld [vmem:[#allocation5 + $0x88] ss:$16 sps:$4 sm:$0xff]  }
  0x67   :  { %1710 = vmatprep.subr.bf16.mxu0 %v3124_v29  ;;  %v3164_v60 = vld [vmem:[#allocation5 + $0x1c4] ss:$16 sps:$4 sm:$0xff]   ;;  %v3168_v62 = vld [vmem:[#allocation5 + $0x1c0] ss:$16 sps:$4 sm:$0xff]   ;;  %v3211_v29 = vld [vmem:[#allocation5 + $0xac] ss:$16 sps:$4 sm:$0xff]  }
  0x68   :  { %v3166_v61 = vld [vmem:[#allocation5 + $0x3c4] ss:$16 sps:$4 sm:$0xff]   ;;  %v3169_v63 = vld [vmem:[#allocation5 + $0x3c0] ss:$16 sps:$4 sm:$0xff]  }
  0x69   :  { %1670 = vmatpush1.bf16.msra.mxu1 %v3126_v30  ;;  %v3170_v0 = vld [vmem:[#allocation5 + $0x1e4] ss:$16 sps:$4 sm:$0xff]   ;;  %v3174_v2 = vld [vmem:[#allocation5 + $0x1e0] ss:$16 sps:$4 sm:$0xff]  }
  0x6a   :  { %1711 = vmatpush1.bf16.msra.mxu0 %v3127_v31  ;;  %1671 = vmatprep.subr.bf16.mxu1 %v3128_v32  ;;  %v3172_v1 = vld [vmem:[#allocation5 + $0x3e4] ss:$16 sps:$4 sm:$0xff]   ;;  %v3175_v3 = vld [vmem:[#allocation5 + $0x3e0] ss:$16 sps:$4 sm:$0xff]   ;;  %v3209_v31 = vld [vmem:[#allocation5 + $0xa8] ss:$16 sps:$4 sm:$0xff]  }
  0x6b   :  { %1712 = vmatprep.subr.bf16.mxu0 %v3130_v33  ;;  %v81_v4 = vld [vmem:[#allocation2] sm:$0xff]  ;;  %v83_v6 = vld [vmem:[#allocation2 + $0x10] sm:$0xff]  ;;  %v3217_v33 = vld [vmem:[#allocation5 + $0xcc] ss:$16 sps:$4 sm:$0xff]  }
  0x6c   :  { %v3178_v5 = vld [vmem:[#allocation5 + $0x404] ss:$16 sps:$4 sm:$0xff]   ;;  %v3799_v8 = vpack.c.bf16 %v81_v4, %v81_v4  ;;  %v3176_v9 = vld [vmem:[#allocation5 + $0x400] ss:$16 sps:$4 sm:$0xff]   ;;  %v3801_v11 = vpack.c.bf16 %v83_v6, %v83_v6  ;;  %v3265_v4 = vld [vmem:[#allocation5 + $0x1cc] ss:$16 sps:$4 sm:$0xff]  }
  0x6d   :  { %1672 = vmatpush1.bf16.msra.mxu1 %v3132_v34  ;;  %v3184_v12 = vld [vmem:[#allocation5 + $0x424] ss:$16 sps:$4 sm:$0xff]   ;;  %v3182_v14 = vld [vmem:[#allocation5 + $0x420] ss:$16 sps:$4 sm:$0xff]   ;;  %v86_v34 = vld [vmem:[#allocation2 + $0x28] sm:$0xff] }
  0x6e   :  { %1713 = vmatpush1.bf16.msra.mxu0 %v3133_v35  ;;  %1673 = vmatprep.subr.bf16.mxu1 %v3134_v36  ;;  %v3190_v16 = vld [vmem:[#allocation5 + $0x444] ss:$16 sps:$4 sm:$0xff]   ;;  %v3188_v18 = vld [vmem:[#allocation5 + $0x440] ss:$16 sps:$4 sm:$0xff]   ;;  %v3806_v36 = vpack.c.bf16 %v86_v34, %v86_v34  ;;  %v3263_v6 = vld [vmem:[#allocation5 + $0x1c8] ss:$16 sps:$4 sm:$0xff]  }
  0x6f   :  { %1714 = vmatprep.subr.bf16.mxu0 %v3136_v37  ;;  %v3196_v20 = vld [vmem:[#allocation5 + $0x464] ss:$16 sps:$4 sm:$0xff]   ;;  %v3194_v22 = vld [vmem:[#allocation5 + $0x460] ss:$16 sps:$4 sm:$0xff]   ;;  %v3215_v37 = vld [vmem:[#allocation5 + $0xc8] ss:$16 sps:$4 sm:$0xff]  }
  0x70   :  { %v3202_v24 = vld [vmem:[#allocation5 + $0x484] ss:$16 sps:$4 sm:$0xff]   ;;  %v3200_v26 = vld [vmem:[#allocation5 + $0x480] ss:$16 sps:$4 sm:$0xff]  }
  0x71   :  { %1674 = vmatpush1.bf16.msra.mxu1 %v3138_v38  ;;  %v3208_v28 = vld [vmem:[#allocation5 + $0x4a4] ss:$16 sps:$4 sm:$0xff]   ;;  %v3206_v30 = vld [vmem:[#allocation5 + $0x4a0] ss:$16 sps:$4 sm:$0xff]  }
  0x72   :  { %1715 = vmatpush1.bf16.msra.mxu0 %v3139_v39  ;;  %1675 = vmatprep.subr.bf16.mxu1 %v3140_v40  ;;  %v3214_v32 = vld [vmem:[#allocation5 + $0x4c4] ss:$16 sps:$4 sm:$0xff]   ;;  %v3212_v35 = vld [vmem:[#allocation5 + $0x4c0] ss:$16 sps:$4 sm:$0xff]   ;;  %v3223_v39 = vld [vmem:[#allocation5 + $0xec] ss:$16 sps:$4 sm:$0xff]  }
  0x73   :  { %1716 = vmatprep.subr.bf16.mxu0 %v3142_v41  ;;  %v3220_v38 = vld [vmem:[#allocation5 + $0x4e4] ss:$16 sps:$4 sm:$0xff]   ;;  %v3218_v40 = vld [vmem:[#allocation5 + $0x4e0] ss:$16 sps:$4 sm:$0xff]   ;;  %v3221_v41 = vld [vmem:[#allocation5 + $0xe8] ss:$16 sps:$4 sm:$0xff]  }
  0x74   :  { %v3232_v46 = vld [vmem:[#allocation5 + $0x524] ss:$16 sps:$4 sm:$0xff]   ;;  %v3296_v34 = vld [vmem:[#allocation5 + $0x680] ss:$16 sps:$4 sm:$0xff]  }
  0x75   :  { %1676 = vmatpush1.bf16.msra.mxu1 %v3144_v42  ;;  %v3226_v42 = vld [vmem:[#allocation5 + $0x504] ss:$16 sps:$4 sm:$0xff]  }
  0x76   :  { %1717 = vmatpush1.bf16.msra.mxu0 %v3145_v43  ;;  %1677 = vmatprep.subr.bf16.mxu1 %v3146_v44  ;;  %v3229_v43 = vld [vmem:[#allocation5 + $0x10c] ss:$16 sps:$4 sm:$0xff]   ;;  %v3224_v44 = vld [vmem:[#allocation5 + $0x500] ss:$16 sps:$4 sm:$0xff]  }
  0x77   :  { %1718 = vmatprep.subr.bf16.mxu0 %v3148_v45  ;;  %v3227_v45 = vld [vmem:[#allocation5 + $0x108] ss:$16 sps:$4 sm:$0xff]  }
  0x79   :  { %1678 = vmatpush1.bf16.msra.mxu1 %v3150_v47  ;;  %v3235_v47 = vld [vmem:[#allocation5 + $0x12c] ss:$16 sps:$4 sm:$0xff]  }
  0x7a   :  { %1719 = vmatpush1.bf16.msra.mxu0 %v3151_v50  ;;  %1679 = vmatprep.subr.bf16.mxu1 %v3152_v51  ;;  %v3238_v50 = vld [vmem:[#allocation5 + $0x544] ss:$16 sps:$4 sm:$0xff]   ;;  %v3241_v51 = vld [vmem:[#allocation5 + $0x14c] ss:$16 sps:$4 sm:$0xff]  }
  0x7b   :  { %1720 = vmatprep.subr.bf16.mxu0 %v3154_v53  ;;  %v3236_v53 = vld [vmem:[#allocation5 + $0x540] ss:$16 sps:$4 sm:$0xff]  }
  0x7d   :  { %1680 = vmatpush1.bf16.msra.mxu1 %v3156_v54  ;;  %v3239_v54 = vld [vmem:[#allocation5 + $0x148] ss:$16 sps:$4 sm:$0xff]  }
  0x7e   :  { %1721 = vmatpush1.bf16.msra.mxu0 %v3157_v55  ;;  %1681 = vmatprep.subr.bf16.mxu1 %v3158_v56  ;;  %v3244_v55 = vld [vmem:[#allocation5 + $0x564] ss:$16 sps:$4 sm:$0xff]   ;;  %v3247_v56 = vld [vmem:[#allocation5 + $0x16c] ss:$16 sps:$4 sm:$0xff]  }
  0x7f   :  { %1722 = vmatprep.subr.bf16.mxu0 %v3160_v57  ;;  %v3242_v57 = vld [vmem:[#allocation5 + $0x560] ss:$16 sps:$4 sm:$0xff]  }
  0x81   :  { %1682 = vmatpush1.bf16.msra.mxu1 %v3162_v58  ;;  %v3245_v58 = vld [vmem:[#allocation5 + $0x168] ss:$16 sps:$4 sm:$0xff]  }
  0x82   :  { %1723 = vmatpush1.bf16.msra.mxu0 %v3163_v59  ;;  %1683 = vmatprep.subr.bf16.mxu1 %v3164_v60  ;;  %v3250_v59 = vld [vmem:[#allocation5 + $0x584] ss:$16 sps:$4 sm:$0xff]   ;;  %v3253_v60 = vld [vmem:[#allocation5 + $0x18c] ss:$16 sps:$4 sm:$0xff]  }
  0x83   :  { %1724 = vmatprep.subr.bf16.mxu0 %v3166_v61  ;;  %v3248_v61 = vld [vmem:[#allocation5 + $0x580] ss:$16 sps:$4 sm:$0xff]  }
  0x85   :  { %1684 = vmatpush1.bf16.msra.mxu1 %v3168_v62  ;;  %v3251_v62 = vld [vmem:[#allocation5 + $0x188] ss:$16 sps:$4 sm:$0xff]  }
  0x86   :  { %1725 = vmatpush1.bf16.msra.mxu0 %v3169_v63  ;;  %1685 = vmatprep.subr.bf16.mxu1 %v3170_v0  ;;  %v3256_v63 = vld [vmem:[#allocation5 + $0x5a4] ss:$16 sps:$4 sm:$0xff]   ;;  %v3259_v0 = vld [vmem:[#allocation5 + $0x1ac] ss:$16 sps:$4 sm:$0xff]  }
  0x87   :  { %1726 = vmatprep.subr.bf16.mxu0 %v3172_v1  ;;  %v3254_v1 = vld [vmem:[#allocation5 + $0x5a0] ss:$16 sps:$4 sm:$0xff]  }
  0x89   :  { %1686 = vmatpush1.bf16.msra.mxu1 %v3174_v2  ;;  %v3257_v2 = vld [vmem:[#allocation5 + $0x1a8] ss:$16 sps:$4 sm:$0xff]  }
  0x8a   :  { %1727 = vmatpush1.bf16.msra.mxu0 %v3175_v3  ;;  %1819 = vmatprep.subr.bf16.mxu1 %v3181_v7  ;;  %v3262_v3 = vld [vmem:[#allocation5 + $0x5c4] ss:$16 sps:$4 sm:$0xff]  }
  0x8b   :  { %1737 = vmatprep.subr.bf16.mxu0 %v3178_v5  ;;  %v3260_v5 = vld [vmem:[#allocation5 + $0x5c0] ss:$16 sps:$4 sm:$0xff]   ;;  %v3268_v7 = vld [vmem:[#allocation5 + $0x5e4] ss:$16 sps:$4 sm:$0xff]  }
  0x8c   :  { %1688 = vmatmul.mubr.bf16.vlgmr.msra.gmra.mrb[0].mxu1 %v3799_v8 }
  0x8d   :  { %1729 = vmatmul.mubr.bf16.vlgmr.msra.gmra.mrb[0].mxu0 %v3801_v11  ;;  %1820 = vmatpush1.bf16.msra.mxu1 %v3179_v10  ;;  %v3266_v10 = vld [vmem:[#allocation5 + $0x5e0] ss:$16 sps:$4 sm:$0xff]  }
  0x8e   :  { %1738 = vmatpush1.bf16.msra.mxu0 %v3176_v9  ;;  %1821 = vmatprep.subr.bf16.mxu1 %v3187_v13  ;;  %v3271_v9 = vld [vmem:[#allocation5 + $0x1ec] ss:$16 sps:$4 sm:$0xff]   ;;  %v85_v13 = vld [vmem:[#allocation2 + $0x20] sm:$0xff] }
  0x8f   :  { %1739 = vmatprep.subr.bf16.mxu0 %v3184_v12  ;;  %1851 = vmatprep.mubr.bf16.mxu1 %v3793_v48  ;;  %v3230_v48 = vld [vmem:[#allocation5 + $0x520] ss:$16 sps:$4 sm:$0xff]   ;;  %v3269_v12 = vld [vmem:[#allocation5 + $0x1e8] ss:$16 sps:$4 sm:$0xff]  }
  0x90   :  { %1769 = vmatprep.mubr.bf16.mxu0 %v3806_v36 }
  0x91   :  { %1822 = vmatpush1.bf16.msra.mxu1 %v3185_v15  ;;  %v3277_v15 = vld [vmem:[#allocation5 + $0x20c] ss:$16 sps:$4 sm:$0xff]  }
  0x92   :  { %1740 = vmatpush1.bf16.msra.mxu0 %v3182_v14  ;;  %1823 = vmatprep.subr.bf16.mxu1 %v3193_v17  ;;  %v3274_v14 = vld [vmem:[#allocation5 + $0x604] ss:$16 sps:$4 sm:$0xff]   ;;  %v3272_v17 = vld [vmem:[#allocation5 + $0x600] ss:$16 sps:$4 sm:$0xff]  }
  0x93   :  { %1741 = vmatprep.subr.bf16.mxu0 %v3190_v16  ;;  %v3809_v16 = vpack.c.bf16 %v85_v13, %v85_v13  ;;  %v3356_v13 = vld [vmem:[#allocation5 + $0x7c0] ss:$16 sps:$4 sm:$0xff]  }
  0x95   :  { %1824 = vmatpush1.bf16.msra.mxu1 %v3191_v19  ;;  %v3280_v19 = vld [vmem:[#allocation5 + $0x624] ss:$16 sps:$4 sm:$0xff]  }
  0x96   :  { %1742 = vmatpush1.bf16.msra.mxu0 %v3188_v18  ;;  %1825 = vmatprep.subr.bf16.mxu1 %v3199_v21  ;;  %v3275_v18 = vld [vmem:[#allocation5 + $0x208] ss:$16 sps:$4 sm:$0xff]  }
  0x97   :  { %1743 = vmatprep.subr.bf16.mxu0 %v3196_v20  ;;  %v3283_v20 = vld [vmem:[#allocation5 + $0x22c] ss:$16 sps:$4 sm:$0xff]  }
  0x98   :  { %v88_v21 = vld [vmem:[#allocation2 + $0x38] sm:$0xff] }
  0x99   :  { %1826 = vmatpush1.bf16.msra.mxu1 %v3197_v23  ;;  %v3281_v23 = vld [vmem:[#allocation5 + $0x228] ss:$16 sps:$4 sm:$0xff]  }
  0x9a   :  { %1744 = vmatpush1.bf16.msra.mxu0 %v3194_v22  ;;  %1827 = vmatprep.subr.bf16.mxu1 %v3205_v25  ;;  %v3278_v22 = vld [vmem:[#allocation5 + $0x620] ss:$16 sps:$4 sm:$0xff]   ;;  %v3286_v25 = vld [vmem:[#allocation5 + $0x644] ss:$16 sps:$4 sm:$0xff]  }
  0x9b   :  { %1745 = vmatprep.subr.bf16.mxu0 %v3202_v24  ;;  %v3813_v24 = vpack.c.bf16 %v88_v21, %v88_v21  ;;  %v3370_v21 = vld [vmem:[#allocation5 + $0x40c] ss:$16 sps:$4 sm:$0xff]  }
  0x9d   :  { %1828 = vmatpush1.bf16.msra.mxu1 %v3203_v27  ;;  %v3284_v27 = vld [vmem:[#allocation5 + $0x640] ss:$16 sps:$4 sm:$0xff]  }
  0x9e   :  { %1746 = vmatpush1.bf16.msra.mxu0 %v3200_v26  ;;  %1829 = vmatprep.subr.bf16.mxu1 %v3211_v29  ;;  %v3289_v26 = vld [vmem:[#allocation5 + $0x24c] ss:$16 sps:$4 sm:$0xff]   ;;  %v3292_v29 = vld [vmem:[#allocation5 + $0x664] ss:$16 sps:$4 sm:$0xff]  }
  0x9f   :  { %1747 = vmatprep.subr.bf16.mxu0 %v3208_v28  ;;  %v3287_v28 = vld [vmem:[#allocation5 + $0x248] ss:$16 sps:$4 sm:$0xff]  }
  0xa1   :  { %1830 = vmatpush1.bf16.msra.mxu1 %v3209_v31  ;;  %v3293_v31 = vld [vmem:[#allocation5 + $0x268] ss:$16 sps:$4 sm:$0xff]  }
  0xa2   :  { %1748 = vmatpush1.bf16.msra.mxu0 %v3206_v30  ;;  %1831 = vmatprep.subr.bf16.mxu1 %v3217_v33  ;;  %v3290_v30 = vld [vmem:[#allocation5 + $0x660] ss:$16 sps:$4 sm:$0xff]   ;;  %v3301_v33 = vld [vmem:[#allocation5 + $0x28c] ss:$16 sps:$4 sm:$0xff]  }
  0xa3   :  { %1749 = vmatprep.subr.bf16.mxu0 %v3214_v32  ;;  %v3298_v32 = vld [vmem:[#allocation5 + $0x684] ss:$16 sps:$4 sm:$0xff]  }
  0xa5   :  { %1832 = vmatpush1.bf16.msra.mxu1 %v3215_v37  ;;  %v3307_v37 = vld [vmem:[#allocation5 + $0x2ac] ss:$16 sps:$4 sm:$0xff]  }
  0xa6   :  { %1750 = vmatpush1.bf16.msra.mxu0 %v3212_v35  ;;  %1833 = vmatprep.subr.bf16.mxu1 %v3223_v39  ;;  %v3299_v35 = vld [vmem:[#allocation5 + $0x288] ss:$16 sps:$4 sm:$0xff]  }
  0xa7   :  { %1751 = vmatprep.subr.bf16.mxu0 %v3220_v38  ;;  %v3302_v38 = vld [vmem:[#allocation5 + $0x6a0] ss:$16 sps:$4 sm:$0xff]   ;;  %v3305_v39 = vld [vmem:[#allocation5 + $0x2a8] ss:$16 sps:$4 sm:$0xff]  }
  0xa9   :  { %1834 = vmatpush1.bf16.msra.mxu1 %v3221_v41  ;;  %v3313_v41 = vld [vmem:[#allocation5 + $0x2cc] ss:$16 sps:$4 sm:$0xff]  }
  0xaa   :  { %1752 = vmatpush1.bf16.msra.mxu0 %v3218_v40  ;;  %1835 = vmatprep.subr.bf16.mxu1 %v3229_v43  ;;  %v3310_v40 = vld [vmem:[#allocation5 + $0x6c4] ss:$16 sps:$4 sm:$0xff]   ;;  %v3311_v43 = vld [vmem:[#allocation5 + $0x2c8] ss:$16 sps:$4 sm:$0xff]  }
  0xab   :  { %1753 = vmatprep.subr.bf16.mxu0 %v3226_v42  ;;  %v3308_v42 = vld [vmem:[#allocation5 + $0x6c0] ss:$16 sps:$4 sm:$0xff]  }
  0xad   :  { %1836 = vmatpush1.bf16.msra.mxu1 %v3227_v45  ;;  %v3319_v45 = vld [vmem:[#allocation5 + $0x2ec] ss:$16 sps:$4 sm:$0xff]  }
  0xae   :  { %1754 = vmatpush1.bf16.msra.mxu0 %v3224_v44  ;;  %1837 = vmatprep.subr.bf16.mxu1 %v3235_v47  ;;  %v3316_v44 = vld [vmem:[#allocation5 + $0x6e4] ss:$16 sps:$4 sm:$0xff]   ;;  %v3317_v47 = vld [vmem:[#allocation5 + $0x2e8] ss:$16 sps:$4 sm:$0xff]  }
  0xaf   :  { %1755 = vmatprep.subr.bf16.mxu0 %v3232_v46  ;;  %v3314_v46 = vld [vmem:[#allocation5 + $0x6e0] ss:$16 sps:$4 sm:$0xff]  }
  0xb1   :  { %1838 = vmatpush1.bf16.msra.mxu1 %v3233_v49  ;;  %v3325_v49 = vld [vmem:[#allocation5 + $0x30c] ss:$16 sps:$4 sm:$0xff]  }
  0xb2   :  { %1756 = vmatpush1.bf16.msra.mxu0 %v3230_v48  ;;  %1839 = vmatprep.subr.bf16.mxu1 %v3241_v51  ;;  %v3322_v48 = vld [vmem:[#allocation5 + $0x704] ss:$16 sps:$4 sm:$0xff]   ;;  %v3323_v51 = vld [vmem:[#allocation5 + $0x308] ss:$16 sps:$4 sm:$0xff]  }
  0xb3   :  { %1757 = vmatprep.subr.bf16.mxu0 %v3238_v50  ;;  %v3320_v50 = vld [vmem:[#allocation5 + $0x700] ss:$16 sps:$4 sm:$0xff]  }
  0xb5   :  { %1840 = vmatpush1.bf16.msra.mxu1 %v3239_v54  ;;  %v3331_v54 = vld [vmem:[#allocation5 + $0x32c] ss:$16 sps:$4 sm:$0xff]  }
  0xb6   :  { %1758 = vmatpush1.bf16.msra.mxu0 %v3236_v53  ;;  %1841 = vmatprep.subr.bf16.mxu1 %v3247_v56  ;;  %v3328_v53 = vld [vmem:[#allocation5 + $0x724] ss:$16 sps:$4 sm:$0xff]   ;;  %v3329_v56 = vld [vmem:[#allocation5 + $0x328] ss:$16 sps:$4 sm:$0xff]  }
  0xb7   :  { %1759 = vmatprep.subr.bf16.mxu0 %v3244_v55  ;;  %v3326_v55 = vld [vmem:[#allocation5 + $0x720] ss:$16 sps:$4 sm:$0xff]  }
  0xb9   :  { %1842 = vmatpush1.bf16.msra.mxu1 %v3245_v58  ;;  %v3337_v58 = vld [vmem:[#allocation5 + $0x34c] ss:$16 sps:$4 sm:$0xff]  }
  0xba   :  { %1760 = vmatpush1.bf16.msra.mxu0 %v3242_v57  ;;  %1843 = vmatprep.subr.bf16.mxu1 %v3253_v60  ;;  %v3334_v57 = vld [vmem:[#allocation5 + $0x744] ss:$16 sps:$4 sm:$0xff]   ;;  %v3335_v60 = vld [vmem:[#allocation5 + $0x348] ss:$16 sps:$4 sm:$0xff]  }
  0xbb   :  { %1761 = vmatprep.subr.bf16.mxu0 %v3250_v59  ;;  %v3332_v59 = vld [vmem:[#allocation5 + $0x740] ss:$16 sps:$4 sm:$0xff]  }
  0xbd   :  { %1844 = vmatpush1.bf16.msra.mxu1 %v3251_v62  ;;  %v3343_v62 = vld [vmem:[#allocation5 + $0x36c] ss:$16 sps:$4 sm:$0xff]  }
  0xbe   :  { %1762 = vmatpush1.bf16.msra.mxu0 %v3248_v61  ;;  %1845 = vmatprep.subr.bf16.mxu1 %v3259_v0  ;;  %v3340_v61 = vld [vmem:[#allocation5 + $0x764] ss:$16 sps:$4 sm:$0xff]   ;;  %v3341_v0 = vld [vmem:[#allocation5 + $0x368] ss:$16 sps:$4 sm:$0xff]  }
  0xbf   :  { %1763 = vmatprep.subr.bf16.mxu0 %v3256_v63  ;;  %v3338_v63 = vld [vmem:[#allocation5 + $0x760] ss:$16 sps:$4 sm:$0xff]  }
  0xc1   :  { %1846 = vmatpush1.bf16.msra.mxu1 %v3257_v2  ;;  %v3349_v2 = vld [vmem:[#allocation5 + $0x38c] ss:$16 sps:$4 sm:$0xff]  }
  0xc2   :  { %1764 = vmatpush1.bf16.msra.mxu0 %v3254_v1  ;;  %1847 = vmatprep.subr.bf16.mxu1 %v3265_v4  ;;  %v3346_v1 = vld [vmem:[#allocation5 + $0x784] ss:$16 sps:$4 sm:$0xff]   ;;  %v3347_v4 = vld [vmem:[#allocation5 + $0x388] ss:$16 sps:$4 sm:$0xff]  }
  0xc3   :  { %1765 = vmatprep.subr.bf16.mxu0 %v3262_v3  ;;  %v3344_v3 = vld [vmem:[#allocation5 + $0x780] ss:$16 sps:$4 sm:$0xff]  }
  0xc5   :  { %1848 = vmatpush1.bf16.msra.mxu1 %v3263_v6  ;;  %v3355_v6 = vld [vmem:[#allocation5 + $0x3ac] ss:$16 sps:$4 sm:$0xff]  }
  0xc6   :  { %1766 = vmatpush1.bf16.msra.mxu0 %v3260_v5  ;;  %1849 = vmatprep.subr.bf16.mxu1 %v3271_v9  ;;  %v3352_v5 = vld [vmem:[#allocation5 + $0x7a4] ss:$16 sps:$4 sm:$0xff]   ;;  %v3353_v9 = vld [vmem:[#allocation5 + $0x3a8] ss:$16 sps:$4 sm:$0xff]  }
  0xc7   :  { %1767 = vmatprep.subr.bf16.mxu0 %v3268_v7  ;;  %v3350_v7 = vld [vmem:[#allocation5 + $0x7a0] ss:$16 sps:$4 sm:$0xff]  }
  0xc9   :  { %1850 = vmatpush1.bf16.msra.mxu1 %v3269_v12  ;;  %v3361_v12 = vld [vmem:[#allocation5 + $0x3cc] ss:$16 sps:$4 sm:$0xff]  }
  0xca   :  { %1768 = vmatpush1.bf16.msra.mxu0 %v3266_v10  ;;  %1860 = vmatprep.subr.bf16.mxu1 %v3277_v15  ;;  %v3358_v10 = vld [vmem:[#allocation5 + $0x7c4] ss:$16 sps:$4 sm:$0xff]  }
  0xcb   :  { %1778 = vmatprep.subr.bf16.mxu0 %v3274_v14  ;;  %v3359_v14 = vld [vmem:[#allocation5 + $0x3c8] ss:$16 sps:$4 sm:$0xff]   ;;  %v3364_v15 = vld [vmem:[#allocation5 + $0x7e4] ss:$16 sps:$4 sm:$0xff]  }
  0xcc   :  { %1852 = vmatmul.mubr.bf16.vlgmr.msra.gmra.mrb[4].mxu1 %v3799_v8  ;;  %v3295_v8 = vld [vmem:[#allocation5 + $0x26c] ss:$16 sps:$4 sm:$0xff]  }
  0xcd   :  { %1770 = vmatmul.mubr.bf16.vlgmr.msra.gmra.mrb[0].mxu0 %v3809_v16  ;;  %1861 = vmatpush1.bf16.msra.mxu1 %v3275_v18  ;;  %v3362_v18 = vld [vmem:[#allocation5 + $0x7e0] ss:$16 sps:$4 sm:$0xff]  }
  0xce   :  { %1779 = vmatpush1.bf16.msra.mxu0 %v3272_v17  ;;  %1862 = vmatprep.subr.bf16.mxu1 %v3283_v20  ;;  %v3367_v17 = vld [vmem:[#allocation5 + $0x3ec] ss:$16 sps:$4 sm:$0xff]   ;;  %v87_v20 = vld [vmem:[#allocation2 + $0x30] sm:$0xff] }
  0xcf   :  { %1780 = vmatprep.subr.bf16.mxu0 %v3280_v19  ;;  %1810 = vmatprep.mubr.bf16.mxu0 %v3813_v24  ;;  %v3365_v19 = vld [vmem:[#allocation5 + $0x3e8] ss:$16 sps:$4 sm:$0xff]  }
  0xd0   :  { %1892 = vmatprep.mubr.bf16.mxu1 %v3795_v52  ;;  %v3304_v52 = vld [vmem:[#allocation5 + $0x6a4] ss:$16 sps:$4 sm:$0xff]  }
  0xd1   :  { %1863 = vmatpush1.bf16.msra.mxu1 %v3281_v23  ;;  %v3817_v23 = vpack.c.bf16 %v87_v20, %v87_v20  ;;  %v3418_v20 = vld [vmem:[#allocation5 + $0x60c] ss:$16 sps:$4 sm:$0xff]  }
  0xd2   :  { %1781 = vmatpush1.bf16.msra.mxu0 %v3278_v22  ;;  %1864 = vmatprep.subr.bf16.mxu1 %v3289_v26  ;;  %v3368_v22 = vld [vmem:[#allocation5 + $0x408] ss:$16 sps:$4 sm:$0xff]  }
  0xd3   :  { %1782 = vmatprep.subr.bf16.mxu0 %v3286_v25  ;;  %v3373_v25 = vld [vmem:[#allocation5 + $0x42c] ss:$16 sps:$4 sm:$0xff]   ;;  %v3464_v26 = vld [vmem:[#allocation7] ss:$8 sps:$4 sm:$0xff]  }
  0xd5   :  { %1865 = vmatpush1.bf16.msra.mxu1 %v3287_v28  ;;  %v3371_v28 = vld [vmem:[#allocation5 + $0x428] ss:$16 sps:$4 sm:$0xff]  }
  0xd6   :  { %1783 = vmatpush1.bf16.msra.mxu0 %v3284_v27  ;;  %1866 = vmatprep.subr.bf16.mxu1 %v3295_v8  ;;  %v3466_v27 = vld [vmem:[#allocation7 + $0x4] ss:$8 sps:$4 sm:$0xff]  }
  0xd7   :  { %1784 = vmatprep.subr.bf16.mxu0 %v3292_v29  ;;  %v3469_v29 = vld [vmem:[#allocation7 + $0x14] ss:$8 sps:$4 sm:$0xff]  }
  0xd8   :  { %v3376_v8 = vld [vmem:[#allocation5 + $0x44c] ss:$16 sps:$4 sm:$0xff]  }
  0xd9   :  { %1867 = vmatpush1.bf16.msra.mxu1 %v3293_v31  ;;  %v3472_v31 = vld [vmem:[#allocation7 + $0x24] ss:$8 sps:$4 sm:$0xff]  }
  0xda   :  { %1785 = vmatpush1.bf16.msra.mxu0 %v3290_v30  ;;  %1868 = vmatprep.subr.bf16.mxu1 %v3301_v33  ;;  %v3467_v30 = vld [vmem:[#allocation7 + $0x10] ss:$8 sps:$4 sm:$0xff]   ;;  %v3379_v33 = vld [vmem:[#allocation5 + $0x46c] ss:$16 sps:$4 sm:$0xff]  }
  0xdb   :  { %1786 = vmatprep.subr.bf16.mxu0 %v3298_v32  ;;  %v3374_v32 = vld [vmem:[#allocation5 + $0x448] ss:$16 sps:$4 sm:$0xff]  }
  0xdd   :  { %1869 = vmatpush1.bf16.msra.mxu1 %v3299_v35  ;;  %v3382_v35 = vld [vmem:[#allocation5 + $0x48c] ss:$16 sps:$4 sm:$0xff]  }
  0xde   :  { %1787 = vmatpush1.bf16.msra.mxu0 %v3296_v34  ;;  %1870 = vmatprep.subr.bf16.mxu1 %v3307_v37  ;;  %v3377_v34 = vld [vmem:[#allocation5 + $0x468] ss:$16 sps:$4 sm:$0xff]   ;;  %v3478_v37 = vld [vmem:[#allocation7 + $0x44] ss:$8 sps:$4 sm:$0xff]  }
  0xdf   :  { %1788 = vmatprep.subr.bf16.mxu0 %v3304_v52  ;;  %v3475_v52 = vld [vmem:[#allocation7 + $0x34] ss:$8 sps:$4 sm:$0xff]  }
  0xe1   :  { %1871 = vmatpush1.bf16.msra.mxu1 %v3305_v39  ;;  %v3385_v39 = vld [vmem:[#allocation5 + $0x4ac] ss:$16 sps:$4 sm:$0xff]  }
  0xe2   :  { %1789 = vmatpush1.bf16.msra.mxu0 %v3302_v38  ;;  %1872 = vmatprep.subr.bf16.mxu1 %v3313_v41  ;;  %v3380_v38 = vld [vmem:[#allocation5 + $0x488] ss:$16 sps:$4 sm:$0xff]   ;;  %v3481_v41 = vld [vmem:[#allocation7 + $0x54] ss:$8 sps:$4 sm:$0xff]  }
  0xe3   :  { %1790 = vmatprep.subr.bf16.mxu0 %v3310_v40  ;;  %v3476_v40 = vld [vmem:[#allocation7 + $0x40] ss:$8 sps:$4 sm:$0xff]  }
  0xe5   :  { %1873 = vmatpush1.bf16.msra.mxu1 %v3311_v43  ;;  %v3388_v43 = vld [vmem:[#allocation5 + $0x4cc] ss:$16 sps:$4 sm:$0xff]  }
  0xe6   :  { %1791 = vmatpush1.bf16.msra.mxu0 %v3308_v42  ;;  %1874 = vmatprep.subr.bf16.mxu1 %v3319_v45  ;;  %v3383_v42 = vld [vmem:[#allocation5 + $0x4a8] ss:$16 sps:$4 sm:$0xff]   ;;  %v3484_v45 = vld [vmem:[#allocation7 + $0x64] ss:$8 sps:$4 sm:$0xff]  }
  0xe7   :  { %1792 = vmatprep.subr.bf16.mxu0 %v3316_v44  ;;  %v3479_v44 = vld [vmem:[#allocation7 + $0x50] ss:$8 sps:$4 sm:$0xff]  }
  0xe9   :  { %1875 = vmatpush1.bf16.msra.mxu1 %v3317_v47  ;;  %v3391_v47 = vld [vmem:[#allocation5 + $0x4ec] ss:$16 sps:$4 sm:$0xff]  }
  0xea   :  { %1793 = vmatpush1.bf16.msra.mxu0 %v3314_v46  ;;  %1876 = vmatprep.subr.bf16.mxu1 %v3325_v49  ;;  %v3386_v46 = vld [vmem:[#allocation5 + $0x4c8] ss:$16 sps:$4 sm:$0xff]   ;;  %v3487_v49 = vld [vmem:[#allocation7 + $0x74] ss:$8 sps:$4 sm:$0xff]  }
  0xeb   :  { %1794 = vmatprep.subr.bf16.mxu0 %v3322_v48  ;;  %v3482_v48 = vld [vmem:[#allocation7 + $0x60] ss:$8 sps:$4 sm:$0xff]  }
  0xed   :  { %1877 = vmatpush1.bf16.msra.mxu1 %v3323_v51  ;;  %v3394_v51 = vld [vmem:[#allocation5 + $0x50c] ss:$16 sps:$4 sm:$0xff]  }
  0xee   :  { %1795 = vmatpush1.bf16.msra.mxu0 %v3320_v50  ;;  %1878 = vmatprep.subr.bf16.mxu1 %v3331_v54  ;;  %v3389_v50 = vld [vmem:[#allocation5 + $0x4e8] ss:$16 sps:$4 sm:$0xff]   ;;  %v3490_v54 = vld [vmem:[#allocation7 + $0x84] ss:$8 sps:$4 sm:$0xff]  }
  0xef   :  { %1796 = vmatprep.subr.bf16.mxu0 %v3328_v53  ;;  %v3485_v53 = vld [vmem:[#allocation7 + $0x70] ss:$8 sps:$4 sm:$0xff]  }
  0xf1   :  { %1879 = vmatpush1.bf16.msra.mxu1 %v3329_v56  ;;  %v3397_v56 = vld [vmem:[#allocation5 + $0x52c] ss:$16 sps:$4 sm:$0xff]  }
  0xf2   :  { %1797 = vmatpush1.bf16.msra.mxu0 %v3326_v55  ;;  %1880 = vmatprep.subr.bf16.mxu1 %v3337_v58  ;;  %v3392_v55 = vld [vmem:[#allocation5 + $0x508] ss:$16 sps:$4 sm:$0xff]   ;;  %v3493_v58 = vld [vmem:[#allocation7 + $0x94] ss:$8 sps:$4 sm:$0xff]  }
  0xf3   :  { %1798 = vmatprep.subr.bf16.mxu0 %v3334_v57  ;;  %v3488_v57 = vld [vmem:[#allocation7 + $0x80] ss:$8 sps:$4 sm:$0xff]  }
  0xf5   :  { %1881 = vmatpush1.bf16.msra.mxu1 %v3335_v60  ;;  %v3400_v60 = vld [vmem:[#allocation5 + $0x54c] ss:$16 sps:$4 sm:$0xff]  }
  0xf6   :  { %1799 = vmatpush1.bf16.msra.mxu0 %v3332_v59  ;;  %1882 = vmatprep.subr.bf16.mxu1 %v3343_v62  ;;  %v3395_v59 = vld [vmem:[#allocation5 + $0x528] ss:$16 sps:$4 sm:$0xff]   ;;  %v3496_v62 = vld [vmem:[#allocation7 + $0xa4] ss:$8 sps:$4 sm:$0xff]  }
  0xf7   :  { %1800 = vmatprep.subr.bf16.mxu0 %v3340_v61  ;;  %v3491_v61 = vld [vmem:[#allocation7 + $0x90] ss:$8 sps:$4 sm:$0xff]  }
  0xf9   :  { %1883 = vmatpush1.bf16.msra.mxu1 %v3341_v0  ;;  %v3403_v0 = vld [vmem:[#allocation5 + $0x56c] ss:$16 sps:$4 sm:$0xff]  }
  0xfa   :  { %1801 = vmatpush1.bf16.msra.mxu0 %v3338_v63  ;;  %1884 = vmatprep.subr.bf16.mxu1 %v3349_v2  ;;  %v3398_v63 = vld [vmem:[#allocation5 + $0x548] ss:$16 sps:$4 sm:$0xff]   ;;  %v3499_v2 = vld [vmem:[#allocation7 + $0xb4] ss:$8 sps:$4 sm:$0xff]  }
  0xfb   :  { %1802 = vmatprep.subr.bf16.mxu0 %v3346_v1  ;;  %v3494_v1 = vld [vmem:[#allocation7 + $0xa0] ss:$8 sps:$4 sm:$0xff]  }
  0xfd   :  { %1885 = vmatpush1.bf16.msra.mxu1 %v3347_v4  ;;  %v3406_v4 = vld [vmem:[#allocation5 + $0x58c] ss:$16 sps:$4 sm:$0xff]  }
  0xfe   :  { %1803 = vmatpush1.bf16.msra.mxu0 %v3344_v3  ;;  %1886 = vmatprep.subr.bf16.mxu1 %v3355_v6  ;;  %v3401_v3 = vld [vmem:[#allocation5 + $0x568] ss:$16 sps:$4 sm:$0xff]   ;;  %v3502_v6 = vld [vmem:[#allocation7 + $0xc4] ss:$8 sps:$4 sm:$0xff]  }
  0xff   :  { %1804 = vmatprep.subr.bf16.mxu0 %v3352_v5  ;;  %v3497_v5 = vld [vmem:[#allocation7 + $0xb0] ss:$8 sps:$4 sm:$0xff]  }
 0x101   :  { %1887 = vmatpush1.bf16.msra.mxu1 %v3353_v9  ;;  %v3409_v9 = vld [vmem:[#allocation5 + $0x5ac] ss:$16 sps:$4 sm:$0xff]  }
 0x102   :  { %1805 = vmatpush1.bf16.msra.mxu0 %v3350_v7  ;;  %1888 = vmatprep.subr.bf16.mxu1 %v3361_v12  ;;  %v3404_v7 = vld [vmem:[#allocation5 + $0x588] ss:$16 sps:$4 sm:$0xff]   ;;  %v3505_v12 = vld [vmem:[#allocation7 + $0xd4] ss:$8 sps:$4 sm:$0xff]  }
 0x103   :  { %1806 = vmatprep.subr.bf16.mxu0 %v3358_v10  ;;  %v3500_v10 = vld [vmem:[#allocation7 + $0xc0] ss:$8 sps:$4 sm:$0xff]  }
 0x105   :  { %1889 = vmatpush1.bf16.msra.mxu1 %v3359_v14  ;;  %v3412_v14 = vld [vmem:[#allocation5 + $0x5cc] ss:$16 sps:$4 sm:$0xff]  }
 0x106   :  { %1807 = vmatpush1.bf16.msra.mxu0 %v3356_v13  ;;  %1890 = vmatprep.subr.bf16.mxu1 %v3367_v17  ;;  %v3407_v13 = vld [vmem:[#allocation5 + $0x5a8] ss:$16 sps:$4 sm:$0xff]  }
 0x107   :  { %1808 = vmatprep.subr.bf16.mxu0 %v3364_v15  ;;  %v3503_v15 = vld [vmem:[#allocation7 + $0xd0] ss:$8 sps:$4 sm:$0xff]  }
 0x108   :  { %v3410_v17 = vld [vmem:[#allocation5 + $0x5c8] ss:$16 sps:$4 sm:$0xff]  }
 0x109   :  { %1891 = vmatpush1.bf16.msra.mxu1 %v3365_v19  ;;  %v3413_v19 = vld [vmem:[#allocation5 + $0x5e8] ss:$16 sps:$4 sm:$0xff]  }
 0x10a   :  { %1809 = vmatpush1.bf16.msra.mxu0 %v3362_v18  ;;  %1901 = vmatprep.subr.bf16.mxu1 %v3370_v21  ;;  %v3415_v18 = vld [vmem:[#allocation5 + $0x5ec] ss:$16 sps:$4 sm:$0xff]   ;;  %v3416_v21 = vld [vmem:[#allocation5 + $0x608] ss:$16 sps:$4 sm:$0xff]  }
 0x10b   :  { %2395 = vmatprep.subr.bf16.mxu0 %v3466_v27  ;;  %v3422_v27 = vld [vmem:[#allocation5 + $0x648] ss:$16 sps:$4 sm:$0xff]  }
 0x10c   :  { %1893 = vmatmul.mubr.bf16.vlgmr.msra.gmra.mrb[4].mxu1 %v3801_v11  ;;  %v3470_v11 = vld [vmem:[#allocation7 + $0x20] ss:$8 sps:$4 sm:$0xff]  }
 0x10d   :  { %1811 = vmatmul.mubr.bf16.vlgmr.msra.gmra.mrb[0].mxu0 %v3817_v23  ;;  %1902 = vmatpush1.bf16.msra.mxu1 %v3368_v22  ;;  %v3421_v22 = vld [vmem:[#allocation5 + $0x62c] ss:$16 sps:$4 sm:$0xff]  }
 0x10e   :  { %1933 = vmatprep.mubr.bf16.mxu1 %v3806_v36  ;;  %1903 = vmatprep.subr.bf16.mxu1 %v3373_v25  ;;  %v3473_v36 = vld [vmem:[#allocation7 + $0x30] ss:$8 sps:$4 sm:$0xff]  }
 0x10f   :  { %2396 = vmatpush1.bf16.msra.mxu0 %v3464_v26  ;;  %v3419_v25 = vld [vmem:[#allocation5 + $0x628] ss:$16 sps:$4 sm:$0xff]   ;;  %v3424_v26 = vld [vmem:[#allocation5 + $0x64c] ss:$16 sps:$4 sm:$0xff]  }
 0x110   :  { %2397 = vmatprep.subr.bf16.mxu0 %v3469_v29  ;;  %v3425_v29 = vld [vmem:[#allocation5 + $0x668] ss:$16 sps:$4 sm:$0xff]  }
 0x111   :  { %1904 = vmatpush1.bf16.msra.mxu1 %v3371_v28  ;;  %v3427_v28 = vld [vmem:[#allocation5 + $0x66c] ss:$16 sps:$4 sm:$0xff]  }
 0x112   :  { %1905 = vmatprep.subr.bf16.mxu1 %v3376_v8  ;;  %v3430_v8 = vld [vmem:[#allocation5 + $0x68c] ss:$16 sps:$4 sm:$0xff]  }
 0x113   :  { %2398 = vmatpush1.bf16.msra.mxu0 %v3467_v30  ;;  %v3428_v30 = vld [vmem:[#allocation5 + $0x688] ss:$16 sps:$4 sm:$0xff]  }
 0x114   :  { %2399 = vmatprep.subr.bf16.mxu0 %v3472_v31  ;;  %v3433_v31 = vld [vmem:[#allocation5 + $0x6ac] ss:$16 sps:$4 sm:$0xff]  }
 0x115   :  { %1906 = vmatpush1.bf16.msra.mxu1 %v3374_v32  ;;  %v3436_v32 = vld [vmem:[#allocation5 + $0x6cc] ss:$16 sps:$4 sm:$0xff]  }
 0x116   :  { %1907 = vmatprep.subr.bf16.mxu1 %v3379_v33 }
 0x117   :  { %2400 = vmatpush1.bf16.msra.mxu0 %v3470_v11 }
 0x118   :  { %2401 = vmatprep.subr.bf16.mxu0 %v3475_v52  ;;  %v3434_v52 = vld [vmem:[#allocation5 + $0x6c8] ss:$16 sps:$4 sm:$0xff]  }
 0x119   :  { %1908 = vmatpush1.bf16.msra.mxu1 %v3377_v34  ;;  %v3506_v34 = vld [vmem:[#allocation7 + $0xe0] ss:$8 sps:$4 sm:$0xff]  }
 0x11a   :  { %1909 = vmatprep.subr.bf16.mxu1 %v3382_v35 }
 0x11b   :  { %2402 = vmatpush1.bf16.msra.mxu0 %v3473_v36 }
 0x11c   :  { %2403 = vmatprep.subr.bf16.mxu0 %v3478_v37  ;;  %v3439_v37 = vld [vmem:[#allocation5 + $0x6ec] ss:$16 sps:$4 sm:$0xff]  }
 0x11d   :  { %1910 = vmatpush1.bf16.msra.mxu1 %v3380_v38  ;;  %v3511_v38 = vld [vmem:[#allocation7 + $0xf4] ss:$8 sps:$4 sm:$0xff]  }
 0x11e   :  { %1911 = vmatprep.subr.bf16.mxu1 %v3385_v39  ;;  %v3509_v39 = vld [vmem:[#allocation7 + $0xf0] ss:$8 sps:$4 sm:$0xff]  }
 0x11f   :  { %2404 = vmatpush1.bf16.msra.mxu0 %v3476_v40  ;;  %v3437_v40 = vld [vmem:[#allocation5 + $0x6e8] ss:$16 sps:$4 sm:$0xff]  }
 0x120   :  { %2405 = vmatprep.subr.bf16.mxu0 %v3481_v41  ;;  %v3442_v41 = vld [vmem:[#allocation5 + $0x70c] ss:$16 sps:$4 sm:$0xff]  }
 0x121   :  { %1912 = vmatpush1.bf16.msra.mxu1 %v3383_v42  ;;  %v3440_v42 = vld [vmem:[#allocation5 + $0x708] ss:$16 sps:$4 sm:$0xff]  }
 0x122   :  { %1913 = vmatprep.subr.bf16.mxu1 %v3388_v43  ;;  %v3514_v43 = vld [vmem:[#allocation7 + $0x104] ss:$8 sps:$4 sm:$0xff]  }
 0x123   :  { %2406 = vmatpush1.bf16.msra.mxu0 %v3479_v44  ;;  %v3445_v44 = vld [vmem:[#allocation5 + $0x72c] ss:$16 sps:$4 sm:$0xff]  }
 0x124   :  { %2407 = vmatprep.subr.bf16.mxu0 %v3484_v45  ;;  %v3443_v45 = vld [vmem:[#allocation5 + $0x728] ss:$16 sps:$4 sm:$0xff]  }
 0x125   :  { %1914 = vmatpush1.bf16.msra.mxu1 %v3386_v46  ;;  %v3448_v46 = vld [vmem:[#allocation5 + $0x74c] ss:$16 sps:$4 sm:$0xff]  }
 0x126   :  { %1915 = vmatprep.subr.bf16.mxu1 %v3391_v47  ;;  %v3446_v47 = vld [vmem:[#allocation5 + $0x748] ss:$16 sps:$4 sm:$0xff]  }
 0x127   :  { %2408 = vmatpush1.bf16.msra.mxu0 %v3482_v48  ;;  %v3451_v48 = vld [vmem:[#allocation5 + $0x76c] ss:$16 sps:$4 sm:$0xff]  }
 0x128   :  { %2409 = vmatprep.subr.bf16.mxu0 %v3487_v49  ;;  %v3449_v49 = vld [vmem:[#allocation5 + $0x768] ss:$16 sps:$4 sm:$0xff]  }
 0x129   :  { %1916 = vmatpush1.bf16.msra.mxu1 %v3389_v50  ;;  %v3454_v50 = vld [vmem:[#allocation5 + $0x78c] ss:$16 sps:$4 sm:$0xff]  }
 0x12a   :  { %1917 = vmatprep.subr.bf16.mxu1 %v3394_v51  ;;  %v3452_v51 = vld [vmem:[#allocation5 + $0x788] ss:$16 sps:$4 sm:$0xff]  }
 0x12b   :  { %2410 = vmatpush1.bf16.msra.mxu0 %v3485_v53  ;;  %v3457_v53 = vld [vmem:[#allocation5 + $0x7ac] ss:$16 sps:$4 sm:$0xff]  }
 0x12c   :  { %2411 = vmatprep.subr.bf16.mxu0 %v3490_v54  ;;  %v3455_v54 = vld [vmem:[#allocation5 + $0x7a8] ss:$16 sps:$4 sm:$0xff]  }
 0x12d   :  { %1918 = vmatpush1.bf16.msra.mxu1 %v3392_v55  ;;  %v3460_v55 = vld [vmem:[#allocation5 + $0x7cc] ss:$16 sps:$4 sm:$0xff]  }
 0x12e   :  { %1919 = vmatprep.subr.bf16.mxu1 %v3397_v56  ;;  %v3458_v56 = vld [vmem:[#allocation5 + $0x7c8] ss:$16 sps:$4 sm:$0xff]  }
 0x12f   :  { %2412 = vmatpush1.bf16.msra.mxu0 %v3488_v57  ;;  %v3463_v57 = vld [vmem:[#allocation5 + $0x7ec] ss:$16 sps:$4 sm:$0xff]  }
 0x130   :  { %2413 = vmatprep.subr.bf16.mxu0 %v3493_v58  ;;  %v3461_v58 = vld [vmem:[#allocation5 + $0x7e8] ss:$16 sps:$4 sm:$0xff]  }
 0x131   :  { %1920 = vmatpush1.bf16.msra.mxu1 %v3395_v59  ;;  %v355_v59 = vlaneseq }
 0x132   :  { %1921 = vmatprep.subr.bf16.mxu1 %v3400_v60 }
 0x133   :  { %2414 = vmatpush1.bf16.msra.mxu0 %v3491_v61  ;;  %v3825_v60 = vshrl.u32 %v355_v59, 7 }
 0x134   :  { %2415 = vmatprep.subr.bf16.mxu0 %v3496_v62  ;;  %v3831_v62 = vld [vmem:[%s3868_s2] sm:$0xf] }
 0x135   :  { %1922 = vmatpush1.bf16.msra.mxu1 %v3398_v63  ;;  %v357_v61 = vsub.s32 0, %v3825_v60  ;;  %v361_v63 = vsub.s32 1, %v3825_v60  ;;  %v365_v59 = vsub.s32 2, %v3825_v60 }
 0x136   :  { %1923 = vmatprep.subr.bf16.mxu1 %v3403_v0 }
 0x137   :  { %2416 = vmatpush1.bf16.msra.mxu0 %v3494_v1  ;;  %v358_v0 = vrot.slane %v3831_v62, %v357_v61 }
 0x138   :  { %2417 = vmatprep.subr.bf16.mxu0 %v3499_v2 }
 0x139   :  { %1924 = vmatpush1.bf16.msra.mxu1 %v3401_v3 }
 0x13a   :  { %1925 = vmatprep.subr.bf16.mxu1 %v3406_v4 }
 0x13b   :  { %2418 = vmatpush1.bf16.msra.mxu0 %v3497_v5 }
 0x13c   :  { %2419 = vmatprep.subr.bf16.mxu0 %v3502_v6 }
 0x13d   :  { %1926 = vmatpush1.bf16.msra.mxu1 %v3404_v7 }
 0x13e   :  { %1927 = vmatprep.subr.bf16.mxu1 %v3409_v9 }
 0x13f   :  { %2420 = vmatpush1.bf16.msra.mxu0 %v3500_v10 }
 0x140   :  { %2421 = vmatprep.subr.bf16.mxu0 %v3505_v12 }
 0x141   :  { %1928 = vmatpush1.bf16.msra.mxu1 %v3407_v13 }
 0x142   :  { %1929 = vmatprep.subr.bf16.mxu1 %v3412_v14 }
 0x143   :  { %2422 = vmatpush1.bf16.msra.mxu0 %v3503_v15 }
 0x145   :  { %1930 = vmatpush1.bf16.msra.mxu1 %v3410_v17  ;;  %v3512_v17 = vld [vmem:[#allocation7 + $0x100] ss:$8 sps:$4 sm:$0xff]  }
 0x146   :  { %1931 = vmatprep.subr.bf16.mxu1 %v3415_v18 }
 0x149   :  { %1932 = vmatpush1.bf16.msra.mxu1 %v3413_v19  ;;  %v3517_v19 = vld [vmem:[#allocation7 + $0x114] ss:$8 sps:$4 sm:$0xff]  }
 0x14a   :  { %1942 = vmatprep.subr.bf16.mxu1 %v3418_v20  ;;  %v3560_v20 = vld [vmem:[#allocation8 + $0x40] sm:$0xff]  }
 0x14c   :  { %1934 = vmatmul.mubr.bf16.vlgmr.msra.gmra.mrb[4].mxu1 %v3809_v16  ;;  %v3431_v16 = vld [vmem:[#allocation5 + $0x6a8] ss:$16 sps:$4 sm:$0xff]  }
 0x14d   :  { %1943 = vmatpush1.bf16.msra.mxu1 %v3416_v21  ;;  %1974 = vmatprep.mubr.bf16.mxu1 %v3813_v24  ;;  %v3508_v24 = vld [vmem:[#allocation7 + $0xe4] ss:$8 sps:$4 sm:$0xff]  }
 0x14e   :  { %1944 = vmatprep.subr.bf16.mxu1 %v3421_v22  ;;  %2423 = vmatprep.subr.bf16.mxu0 %v3508_v24  ;;  %v3561_v21 = vld [vmem:[#allocation8] sm:$0xff]   ;;  %v3562_v22 = vld [vmem:[#allocation8 + $0x48] sm:$0xff]  }
 0x14f   :  { %2424 = vmatpush1.bf16.msra.mxu0 %v3506_v34  ;;  %v3568_v24 = vld [vmem:[#allocation8 + $0x60] sm:$0xff]   ;;  %v3529_v34 = vld [vmem:[#allocation7 + $0x154] ss:$8 sps:$4 sm:$0xff]  }
 0x150   :  { %2425 = vmatprep.subr.bf16.mxu0 %v3511_v38  ;;  %v3571_v38 = vld [vmem:[#allocation8 + $0x28] sm:$0xff]  }
 0x151   :  { %1945 = vmatpush1.bf16.msra.mxu1 %v3419_v25  ;;  %v3515_v25 = vld [vmem:[#allocation7 + $0x110] ss:$8 sps:$4 sm:$0xff]  }
 0x152   :  { %1946 = vmatprep.subr.bf16.mxu1 %v3424_v26  ;;  %v3520_v26 = vld [vmem:[#allocation7 + $0x124] ss:$8 sps:$4 sm:$0xff]  }
 0x153   :  { %2426 = vmatpush1.bf16.msra.mxu0 %v3509_v39  ;;  %v3530_v39 = vld [vmem:[#allocation7 + $0x160] ss:$8 sps:$4 sm:$0xff]  }
 0x154   :  { %2436 = vmatprep.subr.bf16.mxu0 %v3514_v43  ;;  %v3536_v43 = vld [vmem:[#allocation7 + $0x180] ss:$8 sps:$4 sm:$0xff]  }
 0x155   :  { %1947 = vmatpush1.bf16.msra.mxu1 %v3422_v27  ;;  %v3563_v27 = vld [vmem:[#allocation8 + $0x8] sm:$0xff]  }
 0x156   :  { %1948 = vmatprep.subr.bf16.mxu1 %v3427_v28  ;;  %v3564_v28 = vld [vmem:[#allocation8 + $0x50] sm:$0xff]  }
 0x159   :  { %1949 = vmatpush1.bf16.msra.mxu1 %v3425_v29  ;;  %v3518_v29 = vld [vmem:[#allocation7 + $0x120] ss:$8 sps:$4 sm:$0xff]  }
 0x15a   :  { %1950 = vmatprep.subr.bf16.mxu1 %v3430_v8  ;;  %v3523_v8 = vld [vmem:[#allocation7 + $0x134] ss:$8 sps:$4 sm:$0xff]  }
 0x15d   :  { %1951 = vmatpush1.bf16.msra.mxu1 %v3428_v30  ;;  %v3565_v30 = vld [vmem:[#allocation8 + $0x10] sm:$0xff]  }
 0x15e   :  { %1952 = vmatprep.subr.bf16.mxu1 %v3433_v31  ;;  %v3566_v31 = vld [vmem:[#allocation8 + $0x58] sm:$0xff]  }
 0x15f   :  { %v1689_v33 = vpop.f32.mrb[0].mxu1 }
 0x160   :  { %v1691_v11 = vpop.f32.mrb[1].mxu1  ;;  %v1690_v1 = vadd.f32 %v1689_v33, %v358_v0  ;;  %v3567_v33 = vld [vmem:[#allocation8 + $0x18] sm:$0xff]   ;;  %v369_v0 = vsub.s32 3, %v3825_v60  ;;  %v2998_v60 = vld [vmem:[%s3872_s6] ss:$0 sm:$0xff] }
 0x161   :  { %v1693_v35 = vpop.f32.mrb[2].mxu1  ;;  %1953 = vmatpush1.bf16.msra.mxu1 %v3431_v16  ;;  %v3521_v16 = vld [vmem:[#allocation7 + $0x130] ss:$8 sps:$4 sm:$0xff]  }
 0x162   :  { %v1694_v36 = vpop.f32.mrb[3].mxu1  ;;  %1954 = vmatprep.subr.bf16.mxu1 %v3436_v32  ;;  %v3526_v32 = vld [vmem:[#allocation7 + $0x144] ss:$8 sps:$4 sm:$0xff]  }
 0x163   :  { %v3569_v35 = vld [vmem:[#allocation8 + $0x20] sm:$0xff]   ;;  %v3527_v36 = vld [vmem:[#allocation7 + $0x150] ss:$8 sps:$4 sm:$0xff]  }
 0x165   :  { %1955 = vmatpush1.bf16.msra.mxu1 %v3434_v52  ;;  %v3570_v52 = vld [vmem:[#allocation8 + $0x68] sm:$0xff]  }
 0x166   :  { %1956 = vmatprep.subr.bf16.mxu1 %v3439_v37  ;;  %v3532_v37 = vld [vmem:[#allocation7 + $0x164] ss:$8 sps:$4 sm:$0xff]  }
 0x169   :  { %1957 = vmatpush1.bf16.msra.mxu1 %v3437_v40  ;;  %v3535_v40 = vld [vmem:[#allocation7 + $0x174] ss:$8 sps:$4 sm:$0xff]  }
 0x16a   :  { %1958 = vmatprep.subr.bf16.mxu1 %v3442_v41  ;;  %v3533_v41 = vld [vmem:[#allocation7 + $0x170] ss:$8 sps:$4 sm:$0xff]  }
 0x16d   :  { %1959 = vmatpush1.bf16.msra.mxu1 %v3440_v42  ;;  %v3538_v42 = vld [vmem:[#allocation7 + $0x184] ss:$8 sps:$4 sm:$0xff]  }
 0x16e   :  { %1960 = vmatprep.subr.bf16.mxu1 %v3445_v44  ;;  %v3541_v44 = vld [vmem:[#allocation7 + $0x194] ss:$8 sps:$4 sm:$0xff]  }
 0x171   :  { %1961 = vmatpush1.bf16.msra.mxu1 %v3443_v45  ;;  %v3539_v45 = vld [vmem:[#allocation7 + $0x190] ss:$8 sps:$4 sm:$0xff]  }
 0x172   :  { %1962 = vmatprep.subr.bf16.mxu1 %v3448_v46  ;;  %v3544_v46 = vld [vmem:[#allocation7 + $0x1a4] ss:$8 sps:$4 sm:$0xff]  }
 0x175   :  { %1963 = vmatpush1.bf16.msra.mxu1 %v3446_v47  ;;  %v3542_v47 = vld [vmem:[#allocation7 + $0x1a0] ss:$8 sps:$4 sm:$0xff]  }
 0x176   :  { %1964 = vmatprep.subr.bf16.mxu1 %v3451_v48  ;;  %v3547_v48 = vld [vmem:[#allocation7 + $0x1b4] ss:$8 sps:$4 sm:$0xff]  }
 0x179   :  { %1965 = vmatpush1.bf16.msra.mxu1 %v3449_v49  ;;  %v3545_v49 = vld [vmem:[#allocation7 + $0x1b0] ss:$8 sps:$4 sm:$0xff]  }
 0x17a   :  { %1966 = vmatprep.subr.bf16.mxu1 %v3454_v50  ;;  %v3550_v50 = vld [vmem:[#allocation7 + $0x1c4] ss:$8 sps:$4 sm:$0xff]  }
 0x17d   :  { %1967 = vmatpush1.bf16.msra.mxu1 %v3452_v51  ;;  %v3548_v51 = vld [vmem:[#allocation7 + $0x1c0] ss:$8 sps:$4 sm:$0xff]  }
 0x17e   :  { %1968 = vmatprep.subr.bf16.mxu1 %v3457_v53  ;;  %v3553_v53 = vld [vmem:[#allocation7 + $0x1d4] ss:$8 sps:$4 sm:$0xff]  }
 0x181   :  { %1969 = vmatpush1.bf16.msra.mxu1 %v3455_v54  ;;  %v3551_v54 = vld [vmem:[#allocation7 + $0x1d0] ss:$8 sps:$4 sm:$0xff]  }
 0x182   :  { %1970 = vmatprep.subr.bf16.mxu1 %v3460_v55  ;;  %v3556_v55 = vld [vmem:[#allocation7 + $0x1e4] ss:$8 sps:$4 sm:$0xff]  }
 0x185   :  { %1971 = vmatpush1.bf16.msra.mxu1 %v3458_v56  ;;  %v3554_v56 = vld [vmem:[#allocation7 + $0x1e0] ss:$8 sps:$4 sm:$0xff]  }
 0x186   :  { %1972 = vmatprep.subr.bf16.mxu1 %v3463_v57  ;;  %v3559_v57 = vld [vmem:[#allocation7 + $0x1f4] ss:$8 sps:$4 sm:$0xff]  }
 0x189   :  { %1973 = vmatpush1.bf16.msra.mxu1 %v3461_v58  ;;  %v3557_v58 = vld [vmem:[#allocation7 + $0x1f0] ss:$8 sps:$4 sm:$0xff]  }
 0x18a   :  { %3015 = vmatprep.subr.bf16.mxu1 %v3560_v20  ;;  %v2063_v20 = vld [vmem:[%s3870_s4] sm:$0x3] }
 0x18c   :  { %1975 = vmatmul.mubr.bf16.vlgmr.msra.gmra.mrb[4].mxu1 %v3817_v23  ;;  %v362_v23 = vrot.slane %v3831_v62, %v361_v63 }
 0x18d   :  { %3016 = vmatpush3.bf16.msra.mxu1 %v3561_v21  ;;  %v2068_v21 = vrot.slane %v2063_v20, %v357_v61 }
 0x18e   :  { %v1692_v2 = vadd.f32 %v1691_v11, %v362_v23  ;;  %3017 = vmatprep.subr.bf16.mxu1 %v3562_v22  ;;  %v3524_v11 = vld [vmem:[#allocation7 + $0x140] ss:$8 sps:$4 sm:$0xff]   ;;  %v366_v23 = vrot.slane %v3831_v62, %v365_v59  ;;  %v2072_v22 = vrot.slane %v2063_v20, %v361_v63 }
 0x191   :  { %3018 = vmatpush3.bf16.msra.mxu1 %v3563_v27 }
 0x192   :  { %3019 = vmatprep.subr.bf16.mxu1 %v3564_v28 }
 0x195   :  { %3020 = vmatpush3.bf16.msra.mxu1 %v3565_v30 }
 0x196   :  { %3021 = vmatprep.subr.bf16.mxu1 %v3566_v31 }
 0x199   :  { %3022 = vmatpush3.bf16.msra.mxu1 %v3567_v33 }
 0x19a   :  { %3023 = vmatprep.subr.bf16.mxu1 %v3568_v24 }
 0x19d   :  { %3024 = vmatpush3.bf16.msra.mxu1 %v3569_v35 }
 0x19e   :  { %3025 = vmatprep.subr.bf16.mxu1 %v3570_v52 }
 0x1a1   :  { %3026 = vmatpush3.bf16.msra.mxu1 %v3571_v38 }
 0x1e0   :  { %v1812_v3 = vpop.f32.mrb[0].mxu0 }
 0x1e1   :  { %v3038_v4 = vadd.f32 %v1812_v3, %v1690_v1  ;;  %v1814_v5 = vpop.f32.mrb[1].mxu0  ;;  %v370_v1 = vrot.slane %v3831_v62, %v369_v0  ;;  %v3574_v62 = vld [vmem:[#allocation8 + $0x78] sm:$0xff]  }
 0x1e2   :  { %v3040_v6 = vadd.f32 %v1814_v5, %v1692_v2  ;;  %v1816_v7 = vpop.f32.mrb[2].mxu0 }
 0x1e3   :  { %vm1983_vm0 = vcmp.ge.f32.partialorder %v3038_v4, 0.0  ;;  %v1987_v9 = vmul.f32 0.01, %v3038_v4  ;;  %v1817_v10 = vpop.f32.mrb[3].mxu0 }
 0x1e4   :  { %vm1984_vm1 = vcmp.ge.f32.partialorder %v3040_v6, 0.0  ;;  %v1988_v12 = vmul.f32 0.01, %v3040_v6 }
 0x1e5   :  { %v1991_v13 = vsel %vm1983_vm0, %v3038_v4, %v1987_v9 }
 0x1e6   :  { %v1992_v14 = vsel %vm1984_vm1, %v3040_v6, %v1988_v12  ;;  %v1995_v18 = vpack.c.bf16 %v1991_v13, %v1991_v13 }
 0x1e7   :  { %v1996_v15 = vpack.c.bf16 %v1992_v14, %v1992_v14 }
 0x1e9   :  { %2427 = vmatprep.mubr.bf16.mxu0 %v1996_v15 }
 0x1ea   :  { %2428 = vmatmul.mubr.bf16.vlgmr.msra.gmra.mrb[4].mxu0 %v1995_v18  ;;  %v3573_v18 = vld [vmem:[#allocation8 + $0x30] sm:$0xff]  }
 0x1eb   :  { %2437 = vmatpush1.bf16.msra.mxu0 %v3512_v17  ;;  %v3572_v17 = vld [vmem:[#allocation8 + $0x70] sm:$0xff]  }
 0x1ec   :  { %2438 = vmatprep.subr.bf16.mxu0 %v3517_v19  ;;  %3027 = vmatprep.subr.bf16.mxu1 %v3572_v17  ;;  %v3575_v19 = vld [vmem:[#allocation8 + $0x38] sm:$0xff]  }
 0x1ed   :  { %3028 = vmatpush3.bf16.msra.mxu1 %v3573_v18 }
 0x1ee   :  { %3029 = vmatprep.subr.bf16.mxu1 %v3574_v62 }
 0x1ef   :  { %2439 = vmatpush1.bf16.msra.mxu0 %v3515_v25 }
 0x1f0   :  { %2440 = vmatprep.subr.bf16.mxu0 %v3520_v26 }
 0x1f1   :  { %3030 = vmatpush3.bf16.msra.mxu1 %v3575_v19 }
 0x1f3   :  { %2441 = vmatpush1.bf16.msra.mxu0 %v3518_v29 }
 0x1f4   :  { %2442 = vmatprep.subr.bf16.mxu0 %v3523_v8 }
 0x1f7   :  { %2443 = vmatpush1.bf16.msra.mxu0 %v3521_v16 }
 0x1f8   :  { %2444 = vmatprep.subr.bf16.mxu0 %v3526_v32 }
 0x1fb   :  { %2445 = vmatpush1.bf16.msra.mxu0 %v3524_v11 }
 0x1fc   :  { %2446 = vmatprep.subr.bf16.mxu0 %v3529_v34 }
 0x1ff   :  { %2447 = vmatpush1.bf16.msra.mxu0 %v3527_v36 }
 0x200   :  { %2448 = vmatprep.subr.bf16.mxu0 %v3532_v37 }
 0x203   :  { %2449 = vmatpush1.bf16.msra.mxu0 %v3530_v39 }
 0x204   :  { %2450 = vmatprep.subr.bf16.mxu0 %v3535_v40 }
 0x207   :  { %2451 = vmatpush1.bf16.msra.mxu0 %v3533_v41 }
 0x208   :  { %2452 = vmatprep.subr.bf16.mxu0 %v3538_v42 }
 0x20b   :  { %2453 = vmatpush1.bf16.msra.mxu0 %v3536_v43 }
 0x20c   :  { %2454 = vmatprep.subr.bf16.mxu0 %v3541_v44 }
 0x20f   :  { %2455 = vmatpush1.bf16.msra.mxu0 %v3539_v45 }
 0x210   :  { %2456 = vmatprep.subr.bf16.mxu0 %v3544_v46 }
 0x213   :  { %2457 = vmatpush1.bf16.msra.mxu0 %v3542_v47 }
 0x214   :  { %2458 = vmatprep.subr.bf16.mxu0 %v3547_v48 }
 0x217   :  { %2459 = vmatpush1.bf16.msra.mxu0 %v3545_v49 }
 0x218   :  { %2460 = vmatprep.subr.bf16.mxu0 %v3550_v50 }
 0x21b   :  { %2461 = vmatpush1.bf16.msra.mxu0 %v3548_v51 }
 0x21c   :  { %2462 = vmatprep.subr.bf16.mxu0 %v3553_v53 }
 0x21f   :  { %2463 = vmatpush1.bf16.msra.mxu0 %v3551_v54 }
 0x220   :  { %2464 = vmatprep.subr.bf16.mxu0 %v3556_v55 }
 0x223   :  { %2465 = vmatpush1.bf16.msra.mxu0 %v3554_v56 }
 0x224   :  { %2466 = vmatprep.subr.bf16.mxu0 %v3559_v57 }
 0x227   :  { %2467 = vmatpush1.bf16.msra.mxu0 %v3557_v58 }
 0x25f   :  { %v1976_v2 = vpop.f32.mrb[4].mxu1 }
 0x260   :  { %v3041_v3 = vadd.f32 %v1976_v2, %v366_v23  ;;  %v1978_v4 = vpop.f32.mrb[5].mxu1 }
 0x261   :  { %v3042_v5 = vadd.f32 %v1978_v4, %v370_v1  ;;  %v1980_v6 = vpop.f32.mrb[6].mxu1 }
 0x262   :  { %vm1985_vm2 = vcmp.ge.f32.partialorder %v3041_v3, 0.0  ;;  %v1989_v7 = vmul.f32 0.01, %v3041_v3  ;;  %v1981_v9 = vpop.f32.mrb[7].mxu1 }
 0x263   :  { %vm1986_vm3 = vcmp.ge.f32.partialorder %v3042_v5, 0.0  ;;  %v1990_v10 = vmul.f32 0.01, %v3042_v5 }
 0x264   :  { %v1993_v12 = vsel %vm1985_vm2, %v3041_v3, %v1989_v7 }
 0x265   :  { %v1994_v13 = vsel %vm1986_vm3, %v3042_v5, %v1990_v10  ;;  %v1997_v15 = vpack.c.bf16 %v1993_v12, %v1993_v12 }
 0x266   :  { %v1998_v14 = vpack.c.bf16 %v1994_v13, %v1994_v13 }
 0x268   :  { %2468 = vmatprep.mubr.bf16.mxu0 %v1998_v14 }
 0x269   :  { %2469 = vmatmul.mubr.bf16.vlgmr.msra.gmra.mrb[4].mxu0 %v1997_v15 }
 0x33c   :  { %v2470_v25 = vpop.f32.mrb[4].mxu0 }
 0x33d   :  { %v3043_v26 = vadd.f32 %v2470_v25, %v2068_v21  ;;  %v2472_v27 = vpop.f32.mrb[5].mxu0 }
 0x33e   :  { %v3044_v28 = vadd.f32 %v2472_v27, %v2072_v22  ;;  %v2474_v29 = vpop.f32.mrb[6].mxu0 }
 0x33f   :  { %vm2477_vm4 = vcmp.ge.f32.partialorder %v3043_v26, 0.0  ;;  %v2479_v8 = vmul.f32 0.01, %v3043_v26  ;;  %v2475_v30 = vpop.f32.mrb[7].mxu0 }
 0x340   :  { %vm2478_vm5 = vcmp.ge.f32.partialorder %v3044_v28, 0.0  ;;  %v2480_v31 = vmul.f32 0.01, %v3044_v28 }
 0x341   :  { %v2481_v16 = vsel %vm2477_vm4, %v3043_v26, %v2479_v8 }
 0x342   :  { %v2482_v32 = vsel %vm2478_vm5, %v3044_v28, %v2480_v31  ;;  %v2483_v24 = vpack.c.bf16 %v2481_v16, %v2481_v16 }
 0x343   :  { %v2484_v33 = vpack.c.bf16 %v2482_v32, %v2482_v32 }
 0x345   :  { %2652 = vmatprep.mubr.bf16.mxu1 %v2484_v33 }
 0x346   :  { %2653 = vmatmul.mubr.bf16.vlgmr.msra.gmra.mrb[8].mxu1 %v2483_v24 }
 0x419   :  { %v3031_v61 = vpop.f32.mrb[8].mxu1 }
 0x41a   :  { %v3032_v63 = vpop.f32.mrb[9].mxu1 }
 0x41b   :  { %v3033_v11 = vadd.f32 %v3032_v63, %v3031_v61  ;;  %v3034_v34 = vpop.f32.mrb[10].mxu1 }
 0x41c   :  { %v3035_v35 = vpop.f32.mrb[11].mxu1 }
 0x41d   :  { %v2655_v52 = vadd.f32 %v3033_v11, %v2998_v60 }
 0x41f   :  { %2660 = vst [vmem:[#allocation10] sm:$0xff] %v2655_v52 }
 0x420   :  { %3675 = shalt.err (!%p3672_p8)
}
 0x421   :  { %s3676_s6 = scalar_lea.hbm %s3873_s7, 128 }
 0x422   :  { %p3677_p9 = scmp.ne.s32.totalorder %s3873_s7, %s3676_s6  ;;  %p3680_p10 = scmp.lt.u32.totalorder %s3676_s6, %s3873_s7 }
 0x424   :  { %p3682_p11 = pnand %p3680_p10, %p3677_p9 }
 0x426   :  { %3685 = shalt.err (!%p3682_p11)
}
 0x427   :  { %2670 = dma.vmem_to_hbm [thread:$0]  %s2668_s9, 128, %s3873_s7, [#allocation4]  }
 0x428   :  { %3692 = dma.done.wait [#allocation4], 128  }
 0x429   :  { %3693 = vsyncadd [#allocation4], 4294967168 }
 0x42a   :  { %2674 = vsyncpa [#allocation3], 1 }
 0x42b   :  { %2675 = vsyncpa [#allocation6], 1 }
 0x42c   :  { %2676 = vsyncpa [#allocation9], 1 }
 0x42d   :  { %2677 = vsyncpa [#allocation4], 1 }

</bundles_post_ra>
